<compile_context>
chip_gen: v6e
topology: v6e:2x2x1
jax: 0.10.0
libtpu: 0.0.40
codegen_flags: <defaults>
</compile_context>

<pallas_src>
import functools
import math

import jax
import jax.numpy as jnp
from jax.experimental import pallas as pl
from jax.experimental.pallas import tpu as pltpu


def _mhsa_kernel(x_ref, wqkv_ref, bqkv_ref, wo_ref, bo_ref, o_ref, *, num_heads):
    """One grid step == one batch element. All tensors fully resident in VMEM."""
    x = x_ref[0]                                  # (S, H), native dtype (bf16 stays bf16)
    S, H = x.shape
    hd = H // num_heads
    scale = 1.0 / math.sqrt(hd)

    # Fused QKV projection: one wide MXU matmul with f32 accumulation.
    qkv = jnp.dot(x, wqkv_ref[...], preferred_element_type=jnp.float32)
    qkv = qkv + bqkv_ref[0].astype(jnp.float32)   # (S, 3H)

    # Fold the 1/sqrt(head_dim) scale into Q (S*H elems) instead of scores (nh*S*S elems).
    q = qkv[:, :H] * scale
    k = qkv[:, H:2 * H]
    v = qkv[:, 2 * H:]

    # Head-batched layout (nh, S, hd): one relayout, then clean batched MXU matmuls.
    qh = q.reshape(S, num_heads, hd).transpose(1, 0, 2).astype(x.dtype)
    kh = k.reshape(S, num_heads, hd).transpose(1, 0, 2).astype(x.dtype)
    vh = v.reshape(S, num_heads, hd).transpose(1, 0, 2).astype(x.dtype)

    # Scores + numerically stable softmax. Divide is moved onto the EUP via reciprocal.
    scores = jnp.einsum("hqd,hkd->hqk", qh, kh,
                        preferred_element_type=jnp.float32)        # (nh, S, S)
    m = jnp.max(scores, axis=-1, keepdims=True)
    p = jnp.exp(scores - m)
    p = p * pl.reciprocal(jnp.sum(p, axis=-1, keepdims=True), approx=True)
    # TODO(synk): attn_dropout / output dropout omitted (eval-mode identity);
    #             attention_mask path not needed (module called with mask=None).

    # Context; probabilities cast to input dtype so the MXU runs at bf16 rate for bf16
    # inputs while accumulation stays f32.
    ctx = jnp.einsum("hqk,hkd->hqd", p.astype(x.dtype), vh,
                     preferred_element_type=jnp.float32)           # (nh, S, hd)
    ctx = ctx.transpose(1, 0, 2).reshape(S, H).astype(x.dtype)     # concat heads

    out = jnp.dot(ctx, wo_ref[...], preferred_element_type=jnp.float32)
    out = out + bo_ref[0].astype(jnp.float32)
    o_ref[0] = out.astype(o_ref.dtype)


def mhsa_forward(x, wq, bq, wk, bk, wv, bv, wo, bo, *, num_heads):
    B, S, H = x.shape
    # Fuse QKV host-side: one (H, 3H) weight / (1, 3H) bias.
    wqkv = jnp.concatenate([wq, wk, wv], axis=1)
    bqkv = jnp.concatenate([bq, bk, bv]).reshape(1, 3 * H)
    bo2 = bo.reshape(1, H)

    kernel = functools.partial(_mhsa_kernel, num_heads=num_heads)

    # TODO(synk): for production sequence lengths (S >= 512) switch to a flash-style
    # (batch, q_block) grid with an online-softmax loop over K/V blocks; at these small
    # shapes the full (nh, S, S) score tensor fits VMEM comfortably. Weight blocks have
    # constant index_maps; on v7x they could additionally be single-buffered to save VMEM.
    return pl.pallas_call(
        kernel,
        out_shape=jax.ShapeDtypeStruct((B, S, H), x.dtype),
        grid_spec=pltpu.PrefetchScalarGridSpec(
            num_scalar_prefetch=0,
            grid=(B,),
            in_specs=[
                pl.BlockSpec((1, S, H), lambda b: (b, 0, 0)),      # x
                pl.BlockSpec((H, 3 * H), lambda b: (0, 0)),        # fused W_qkv
                pl.BlockSpec((1, 3 * H), lambda b: (0, 0)),        # fused b_qkv
                pl.BlockSpec((H, H), lambda b: (0, 0)),            # W_out
                pl.BlockSpec((1, H), lambda b: (0, 0)),            # b_out
            ],
            out_specs=pl.BlockSpec((1, S, H), lambda b: (b, 0, 0)),
        ),
        compiler_params=pltpu.CompilerParams(
            dimension_semantics=("parallel",),
            vmem_limit_bytes=32 * 1024 * 1024,
        ),
    )(x, wqkv, bqkv, wo, bo2)


def mhsa_reference(x, wq, bq, wk, bk, wv, bv, wo, bo, *, num_heads):
    """Plain-JAX reference mirroring the PyTorch forward (eval mode)."""
    B, S, H = x.shape
    hd = H // num_heads
    q = (x @ wq + bq).reshape(B, S, num_heads, hd).transpose(0, 2, 1, 3)
    k = (x @ wk + bk).reshape(B, S, num_heads, hd).transpose(0, 2, 1, 3)
    v = (x @ wv + bv).reshape(B, S, num_heads, hd).transpose(0, 2, 1, 3)
    scores = jnp.einsum("bhqd,bhkd->bhqk", q, k) / math.sqrt(hd)
    p = jax.nn.softmax(scores, axis=-1)
    ctx = jnp.einsum("bhqk,bhkd->bhqd", p, v)
    ctx = ctx.transpose(0, 2, 1, 3).reshape(B, S, H)
    return ctx @ wo + bo


if __name__ == "__main__":
    # Small shapes consistent with the module: hidden=256, heads=4 (per the spec);
    # batch=2, seq=8 kept tiny. H=256 keeps I/O lane-dense (multiple of 128).
    B, S, H, NH = 2, 8, 256, 4

    key = jax.random.PRNGKey(0)
    ks = jax.random.split(key, 9)
    init = lambda k, shape, fan_in: (jax.random.uniform(k, shape, jnp.float32,
                                                        -1.0, 1.0) / math.sqrt(fan_in))
    x = jax.random.normal(ks[0], (B, S, H), jnp.float32)
    # Weights stored as (in, out) so the kernel does x @ W + b.
    wq, bq = init(ks[1], (H, H), H), init(ks[2], (H,), H)
    wk, bk = init(ks[3], (H, H), H), init(ks[4], (H,), H)
    wv, bv = init(ks[5], (H, H), H), init(ks[6], (H,), H)
    wo, bo = init(ks[7], (H, H), H), init(ks[8], (H,), H)

    out = mhsa_forward(x, wq, bq, wk, bk, wv, bv, wo, bo, num_heads=NH)
    out = jax.block_until_ready(out)

    ref = mhsa_reference(x, wq, bq, wk, bk, wv, bv, wo, bo, num_heads=NH)
    assert out.shape == (B, S, H)
    max_err = float(jnp.max(jnp.abs(out - ref)))
    # Tolerance accounts for the EUP approximate-reciprocal softmax denominator.
    assert jnp.allclose(out, ref, atol=2e-3, rtol=2e-3), f"mismatch vs reference: {max_err}"
    print("KERNEL_OK")
</pallas_src>

<mosaic_0001>
module attributes {stable_mosaic.version = 11 : i64} {
  func.func @_mhsa_kernel(%arg0: i32, %arg1: memref<1x8x256xf32, #tpu.memory_space<vmem>>, %arg2: memref<256x768xf32, #tpu.memory_space<vmem>>, %arg3: memref<1x768xf32, #tpu.memory_space<vmem>>, %arg4: memref<256x256xf32, #tpu.memory_space<vmem>>, %arg5: memref<1x256xf32, #tpu.memory_space<vmem>>, %arg6: memref<1x8x256xf32, #tpu.memory_space<vmem>>) attributes {dimension_semantics = [#tpu.dimension_semantics<parallel>], iteration_bounds = array<i64: 2>, scalar_prefetch = 0 : i64, scratch_operands = 0 : i64, tpu.core_type = #tpu.core_type<tc>, window_params = [{transform_indices = @transform_0, window_bounds = array<i64: 1, 8, 256>}, {pipeline_mode = #tpu.pipeline_mode<synchronous>, transform_indices = @transform_1, window_bounds = array<i64: 256, 768>}, {pipeline_mode = #tpu.pipeline_mode<synchronous>, transform_indices = @transform_2, window_bounds = array<i64: 1, 768>}, {pipeline_mode = #tpu.pipeline_mode<synchronous>, transform_indices = @transform_3, window_bounds = array<i64: 256, 256>}, {pipeline_mode = #tpu.pipeline_mode<synchronous>, transform_indices = @transform_4, window_bounds = array<i64: 1, 256>}, {transform_indices = @transform_5, window_bounds = array<i64: 1, 8, 256>}]} {
    %c0 = arith.constant 0 : index
    %c0_0 = arith.constant 0 : index
    %c0_1 = arith.constant 0 : index
    %0 = vector.load %arg1[%c0, %c0_0, %c0_1] : memref<1x8x256xf32, #tpu.memory_space<vmem>>, vector<1x8x256xf32>
    %1 = vector.shape_cast %0 : vector<1x8x256xf32> to vector<8x256xf32>
    %c0_2 = arith.constant 0 : index
    %c0_3 = arith.constant 0 : index
    %2 = vector.load %arg2[%c0_2, %c0_3] : memref<256x768xf32, #tpu.memory_space<vmem>>, vector<256x768xf32>
    %cst = arith.constant dense<0.000000e+00> : vector<8x768xf32>
    %3 = tpu.matmul %1, %2, %cst {dimension_numbers = #tpu.dot_dimension_numbers<[1], [0], [0], [1], [0, 0, 1, 1], [], []>} : vector<8x256xf32>, vector<256x768xf32>, vector<8x768xf32> -> vector<8x768xf32>
    %c0_4 = arith.constant 0 : index
    %c0_5 = arith.constant 0 : index
    %4 = vector.load %arg3[%c0_4, %c0_5] : memref<1x768xf32, #tpu.memory_space<vmem>>, vector<1x768xf32>
    %5 = vector.shape_cast %4 : vector<1x768xf32> to vector<768xf32>
    %6 = vector.shape_cast %5 : vector<768xf32> to vector<1x768xf32>
    %7 = vector.broadcast %6 : vector<1x768xf32> to vector<8x768xf32>
    %8 = arith.addf %3, %7 : vector<8x768xf32>
    %9 = vector.extract_strided_slice %8 {offsets = [0, 0], sizes = [8, 256], strides = [1, 1]} : vector<8x768xf32> to vector<8x256xf32>
    %cst_6 = arith.constant 1.250000e-01 : f32
    %10 = vector.broadcast %cst_6 : f32 to vector<8x256xf32>
    %11 = arith.mulf %9, %10 : vector<8x256xf32>
    %12 = vector.extract_strided_slice %8 {offsets = [0, 256], sizes = [8, 256], strides = [1, 1]} : vector<8x768xf32> to vector<8x256xf32>
    %13 = vector.extract_strided_slice %8 {offsets = [0, 512], sizes = [8, 256], strides = [1, 1]} : vector<8x768xf32> to vector<8x256xf32>
    %14 = vector.shape_cast %11 : vector<8x256xf32> to vector<8x4x64xf32>
    %15 = tpu.transpose %14, [1, 0, 2] : vector<8x4x64xf32> -> vector<4x8x64xf32>
    %16 = vector.shape_cast %12 : vector<8x256xf32> to vector<8x4x64xf32>
    %17 = tpu.transpose %16, [1, 0, 2] : vector<8x4x64xf32> -> vector<4x8x64xf32>
    %18 = vector.shape_cast %13 : vector<8x256xf32> to vector<8x4x64xf32>
    %19 = tpu.transpose %18, [1, 0, 2] : vector<8x4x64xf32> -> vector<4x8x64xf32>
    "tpu.trace_start"() <{level = 10 : i32, message = "hqd,hkd->hqk"}> : () -> ()
    %cst_7 = arith.constant dense<0.000000e+00> : vector<4x8x8xf32>
    %20 = tpu.matmul %15, %17, %cst_7 {dimension_numbers = #tpu.dot_dimension_numbers<[2], [2], [1], [1], [0, 0, 0, 1, 1, 1], [0], [0]>} : vector<4x8x64xf32>, vector<4x8x64xf32>, vector<4x8x8xf32> -> vector<4x8x8xf32>
    "tpu.trace_stop"() : () -> ()
    %cst_8 = arith.constant dense<0xFF800000> : vector<4x8xf32>
    %21 = vector.multi_reduction <maximumf>, %20, %cst_8 [2] : vector<4x8x8xf32> to vector<4x8xf32>
    %22 = vector.shape_cast %21 : vector<4x8xf32> to vector<4x8x1xf32>
    %23 = vector.broadcast %22 : vector<4x8x1xf32> to vector<4x8x8xf32>
    %24 = arith.subf %20, %23 : vector<4x8x8xf32>
    %25 = math.exp %24 : vector<4x8x8xf32>
    %cst_9 = arith.constant dense<0.000000e+00> : vector<4x8xf32>
    %26 = vector.multi_reduction <add>, %25, %cst_9 [2] : vector<4x8x8xf32> to vector<4x8xf32>
    %27 = vector.shape_cast %26 : vector<4x8xf32> to vector<4x8x1xf32>
    %28 = tpu.reciprocal %27 {approx = true} : vector<4x8x1xf32> -> vector<4x8x1xf32>
    %29 = vector.broadcast %28 : vector<4x8x1xf32> to vector<4x8x8xf32>
    %30 = arith.mulf %25, %29 : vector<4x8x8xf32>
    "tpu.trace_start"() <{level = 10 : i32, message = "hqk,hkd->hqd"}> : () -> ()
    %cst_10 = arith.constant dense<0.000000e+00> : vector<4x8x64xf32>
    %31 = tpu.matmul %30, %19, %cst_10 {dimension_numbers = #tpu.dot_dimension_numbers<[2], [1], [1], [2], [0, 0, 0, 1, 1, 2], [0], [0]>} : vector<4x8x8xf32>, vector<4x8x64xf32>, vector<4x8x64xf32> -> vector<4x8x64xf32>
    "tpu.trace_stop"() : () -> ()
    %32 = tpu.transpose %31, [1, 0, 2] : vector<4x8x64xf32> -> vector<8x4x64xf32>
    %33 = vector.shape_cast %32 : vector<8x4x64xf32> to vector<8x256xf32>
    %c0_11 = arith.constant 0 : index
    %c0_12 = arith.constant 0 : index
    %34 = vector.load %arg4[%c0_11, %c0_12] : memref<256x256xf32, #tpu.memory_space<vmem>>, vector<256x256xf32>
    %cst_13 = arith.constant dense<0.000000e+00> : vector<8x256xf32>
    %35 = tpu.matmul %33, %34, %cst_13 {dimension_numbers = #tpu.dot_dimension_numbers<[1], [0], [0], [1], [0, 0, 1, 1], [], []>} : vector<8x256xf32>, vector<256x256xf32>, vector<8x256xf32> -> vector<8x256xf32>
    %c0_14 = arith.constant 0 : index
    %c0_15 = arith.constant 0 : index
    %36 = vector.load %arg5[%c0_14, %c0_15] : memref<1x256xf32, #tpu.memory_space<vmem>>, vector<1x256xf32>
    %37 = vector.shape_cast %36 : vector<1x256xf32> to vector<256xf32>
    %38 = vector.shape_cast %37 : vector<256xf32> to vector<1x256xf32>
    %39 = vector.broadcast %38 : vector<1x256xf32> to vector<8x256xf32>
    %40 = arith.addf %35, %39 : vector<8x256xf32>
    %c0_16 = arith.constant 0 : index
    %c0_17 = arith.constant 0 : index
    %c0_18 = arith.constant 0 : index
    %41 = vector.load %arg6[%c0_16, %c0_17, %c0_18] : memref<1x8x256xf32, #tpu.memory_space<vmem>>, vector<1x8x256xf32>
    %42 = vector.shape_cast %41 : vector<1x8x256xf32> to vector<8x256xf32>
    %43 = vector.shape_cast %40 : vector<8x256xf32> to vector<1x8x256xf32>
    tpu.vector_store %arg6[%c0_16, %c0_17, %c0_18], %43 {strides = array<i32>} : memref<1x8x256xf32, #tpu.memory_space<vmem>>, vector<1x8x256xf32>,
    return
  }
  func.func @transform_0(%arg0: i32) -> (i32, i32, i32) {
    %c0_i32 = arith.constant 0 : i32
    %c0_i32_0 = arith.constant 0 : i32
    %c0_i32_1 = arith.constant 0 : i32
    return %arg0, %c0_i32, %c0_i32_0 : i32, i32, i32
  }
  func.func @transform_1(%arg0: i32) -> (i32, i32) {
    %c0_i32 = arith.constant 0 : i32
    %c0_i32_0 = arith.constant 0 : i32
    %c0_i32_1 = arith.constant 0 : i32
    return %c0_i32, %c0_i32_0 : i32, i32
  }
  func.func @transform_2(%arg0: i32) -> (i32, i32) {
    %c0_i32 = arith.constant 0 : i32
    %c0_i32_0 = arith.constant 0 : i32
    %c0_i32_1 = arith.constant 0 : i32
    return %c0_i32, %c0_i32_0 : i32, i32
  }
  func.func @transform_3(%arg0: i32) -> (i32, i32) {
    %c0_i32 = arith.constant 0 : i32
    %c0_i32_0 = arith.constant 0 : i32
    %c0_i32_1 = arith.constant 0 : i32
    return %c0_i32, %c0_i32_0 : i32, i32
  }
  func.func @transform_4(%arg0: i32) -> (i32, i32) {
    %c0_i32 = arith.constant 0 : i32
    %c0_i32_0 = arith.constant 0 : i32
    %c0_i32_1 = arith.constant 0 : i32
    return %c0_i32, %c0_i32_0 : i32, i32
  }
  func.func @transform_5(%arg0: i32) -> (i32, i32, i32) {
    %c0_i32 = arith.constant 0 : i32
    %c0_i32_0 = arith.constant 0 : i32
    %c0_i32_1 = arith.constant 0 : i32
    return %arg0, %c0_i32, %c0_i32_0 : i32, i32, i32
  }
}

</mosaic_0001>

<bundles_post_ra>
// kernel: tpu_custom_call.1
= control target key start
LH: loop header
LB: loop body
LE: loop exit
PB: predicated region body
PF: predicated region fallthrough
CT: control target
= control target key end

     0   :  { %10 = vsyncpa [#allocation3], 0  ;;  %s2992_s0 = inlined_call_operand.hbm [shape: f32[2,8,256], index: 0, kind: input, shape index: {}]   ;;  %s2993_s1 = inlined_call_operand.hbm [shape: f32[256,768], index: 1, kind: input, shape index: {}]   ;;  %s2994_s2 = inlined_call_operand.hbm [shape: f32[1,768], index: 2, kind: input, shape index: {}]   ;;  %s2995_s3 = inlined_call_operand.hbm [shape: f32[256,256], index: 3, kind: input, shape index: {}]   ;;  %s2996_s4 = inlined_call_operand.vmem [shape: f32[1,256], index: 4, kind: input, shape index: {}]   ;;  %s2997_s5 = inlined_call_operand.hbm [shape: f32[2,8,256], index: 5, kind: output, shape index: {}]  }
   0x1   :  { %12 = vsyncpa [#allocation3 + $0x1], 0 }
   0x2   :  { %13 = vsyncpa [#allocation6], 0 }
   0x3   :  { %14 = vsyncpa [#allocation9], 0 }
   0x4   :  { %15 = vsyncpa [#allocation4], 0 }
   0x5   :  { %17 = vsyncpa [#allocation4 + $0x1], 0  ;;  %s2636_s18 = smov 0   ;;  %s2638_s19 = smov 0  }
   0x6   :  { %s2640_s20 = smov 0   ;;  %s2642_s21 = smov 0  }
   0x7 LB: > { %s2657_s22 = sadd.s32 4294967295, %s2590_s21   ;;  %s2207_s23 = sadd.s32 4294967294, %s2590_s21   ;;  %s2590_s21 = sphi %s2642_s21, %s3021_s21   ;;  %s2586_s20 = sphi %s2640_s20, %s3020_s20   ;;  %s2582_s19 = sphi %s2638_s19, %s3019_s19   ;;  %s2578_s18 = sphi %s2636_s18, %s3018_s18  }
   0x8   : > { %p43_p0 = scmp.ne.s32.totalorder %s2582_s19, %s2578_s18  ;;  %p2998_p1 = scmp.eq.s32.totalorder %s2657_s22, 0 }
   0x9   : > { %p157_p3 = scmp.eq.s32.totalorder %s2207_s23, 1  ;;  %p2208_p5 = scmp.ge.s32.totalorder %s2590_s21, 1 }
   0xa   : > { %p2666_p4 = por %p2998_p1, %p43_p0  ;;  %p164_p7 = scmp.lt.s32.totalorder %s2590_s21, 3 }
   0xb   : > { %p2671_p6 = por %p157_p3, %p43_p0  ;;  %s2592_s27 = smov [#allocation5]  }
   0xc   : > { %s3002_s24 = scalar_select %p2666_p4, 1, 0 }
   0xd   : > { %s3003_s25 = scalar_select %p2671_p6, 1, 0 }
   0xe   : > { %p2676_p8 = pnand %p2208_p5, %p164_p7  ;;  %s176_s28 = sshll.u32 %s2592_s27, 4  ;;  %s177_s28 = int_to_ptr.vmem [resolvable:$true] %s176_s28 }
   0xf   : > { %s2593_s30 = smov [#allocation7]   ;;  %s2594_s7 = smov [#allocation8]  }
  0x10   : > { %s3004_s26 = scalar_select %p2676_p8, 1, 0 }
  0x11   : > { %p2321_p9 = pneg %p2676_p8  ;;  %s190_s6 = sshll.u32 %s2593_s30, 4  ;;  %s191_s6 = int_to_ptr.vmem [resolvable:$true] %s190_s6 }
  0x12   : > { %s200_s8 = sshll.u32 %s2594_s7, 4  ;;  %s2423_s9 = scalar_lea.vmem %s177_s28, 24576  ;;  %s201_s8 = int_to_ptr.vmem [resolvable:$true] %s200_s8 }
  0x13   : > { %p2685_p11 = pnand %p2321_p9, %p2998_p1  ;;  %p2424_p13 = scmp.ne.s32.totalorder %s177_s28, %s2423_s9 }
  0x14   : > { %p2431_p5 = scmp.lt.s32.totalorder %s177_s28, %s177_s28  ;;  %p2432_p7 = scmp.lt.s32.totalorder %s2423_s9, %s2423_s9 }
  0x15   : > { %p2414_p12 = pneg %p2685_p11 }
  0x16   : > { %p2433_p9 = por %p2432_p7, %p2431_p5 }
  0x17   : > { %p2426_p0 = pnand %p2424_p13, %p2414_p12 }
  0x19   : > { %p2427_p3 = pneg %p2426_p0 }
  0x1b   : > { %p2434_p10 = pnand %p2433_p9, %p2427_p3 }
  0x1d   : > { %2437 = shalt.err (!%p2434_p10)
}
  0x1e   : > { %s2595_s10 = smov 768   ;;  %s2596_s11 = smov 48  }
  0x1f   : > { %2324 = dma.hbm_to_vmem [thread:$0]  (!%p2685_p11), %s2993_s1, 24576, %s177_s28, [#allocation6], %s2595_s10, %s2595_s10, %s2596_s11  }
  0x20   : > { %s2449_s14 = scalar_lea.vmem %s191_s6, 96  ;;  %p2457_p2 = scmp.lt.s32.totalorder %s191_s6, %s191_s6 }
  0x21   : > { %p2450_p1 = scmp.ne.s32.totalorder %s191_s6, %s2449_s14  ;;  %p2458_p6 = scmp.lt.s32.totalorder %s2449_s14, %s2449_s14 }
  0x23   : > { %p2452_p13 = pnand %p2450_p1, %p2414_p12  ;;  %p2459_p5 = por %p2458_p6, %p2457_p2 }
  0x25   : > { %p2453_p0 = pneg %p2452_p13 }
  0x27   : > { %p2460_p3 = pnand %p2459_p5, %p2453_p0 }
  0x29   : > { %2463 = shalt.err (!%p2460_p3)
}
  0x2a   : > { %2327 = dma.hbm_to_vmem [thread:$0]  (!%p2685_p11), %s2994_s2, 96, %s191_s6, [#allocation6]  }
  0x2b   : > { %s2475_s17 = scalar_lea.vmem %s201_s8, 8192  ;;  %p2483_p9 = scmp.lt.s32.totalorder %s201_s8, %s201_s8 }
  0x2c   : > { %p2476_p10 = scmp.ne.s32.totalorder %s201_s8, %s2475_s17  ;;  %p2484_p13 = scmp.lt.s32.totalorder %s2475_s17, %s2475_s17 }
  0x2e   : > { %p2478_p7 = pnand %p2476_p10, %p2414_p12  ;;  %p2485_p4 = por %p2484_p13, %p2483_p9 }
  0x30   : > { %p2479_p1 = pneg %p2478_p7 }
  0x32   : > { %p2486_p2 = pnand %p2485_p4, %p2479_p1 }
  0x34   : > { %2489 = shalt.err (!%p2486_p2)
}
  0x35   : > { %s2597_s23 = smov 256   ;;  %s2598_s27 = smov 16  }
  0x36   : > { %2330 = dma.hbm_to_vmem [thread:$0]  (!%p2685_p11), %s2995_s3, 8192, %s201_s8, [#allocation9], %s2597_s23, %s2597_s23, %s2598_s27  }
  0x37   : > { %s2716_s6 = sadd.s32 1, %s2590_s21   ;;  %s30_s9 = sadd.s32 1, %s2586_s20 }
  0x38   : > { %s27_s7 = ssub.s32 %s2590_s21, %s2716_s6  ;;  %p37_p6 = scmp.ne.s32.totalorder %s2586_s20, %s2582_s19 }
  0x39   : > { %p28_p4 = scmp.eq.s32.totalorder %s27_s7, 0  ;;  %p38_p12 = scmp.eq.s32.totalorder %s2590_s21, 0 }
  0x3a   : > { %p2342_p0 = scmp.lt.s32.totalorder %s2590_s21, 2  ;;  %p3006_p3 = scmp.eq.s32.totalorder %s2657_s22, 1 }
  0x3b   : > { %s2726_s10 = scalar_select %p28_p4, %s2586_s20, %s30_s9  }
  0x3c   : > { %p39_p5 = por %p38_p12, %p37_p6  ;;  %p2730_p10 = por %p3006_p3, %p37_p6 }
  0x3d   : > { %s217_s29 = sand.u32 1, %s2586_s20   ;;  %s2247_s12 = sshll.u32 %s2590_s21, 8 }
  0x3e   : > { %s3007_s11 = scalar_select %p2730_p10, 1, 0 }
  0x3f   : > { %s2213_s8 = sshll.u32 %s217_s29, 4  ;;  %s2739_s15 = scalar_lea.hbm %s2992_s0, %s2247_s12 }
  0x40   : > { %s221_s16 = scalar_lea.vmem [#allocation2], %s2213_s8  ;;  %p2741_p11 = pnand %p2342_p0, %p39_p5 }
  0x41   : > { %s229_s17 = sshll.u32 %s221_s16, 4  ;;  %s218_s27 = scalar_lea.sflag [#allocation3], %s217_s29  ;;  %s230_s17 = int_to_ptr.vmem [resolvable:$true] %s229_s17 }
  0x42   : > { %s2490_s28 = scalar_lea.hbm %s2739_s15, 256  ;;  %p2492_p1 = pneg %p2741_p11 }
  0x43   : > { %p2491_p7 = scmp.ne.s32.totalorder %s2739_s15, %s2490_s28  ;;  %s2495_s9 = scalar_lea.hbm %s2992_s0, 512 }
  0x44   : > { %p2496_p2 = scmp.lt.s32.totalorder %s2739_s15, %s2992_s0  ;;  %p2497_p4 = scmp.lt.s32.totalorder %s2495_s9, %s2490_s28 }
  0x45   : > { %p2493_p9 = pnand %p2492_p1, %p2491_p7 }
  0x46   : > { %p2498_p6 = por %p2497_p4, %p2496_p2 }
  0x47   : > { %p2494_p13 = pneg %p2493_p9 }
  0x49   : > { %p2499_p12 = pnand %p2498_p6, %p2494_p13 }
  0x4b   : > { %2502 = shalt.err (!%p2499_p12)
}
  0x4c   : > { %s2503_s13 = scalar_lea.vmem %s230_s17, 256  ;;  %s2599_s29 = smov [#allocation2]  }
  0x4d   : > { %p2504_p0 = scmp.ne.s32.totalorder %s230_s17, %s2503_s13  ;;  %s2508_s14 = sshll.u32 %s2599_s29, 4  ;;  %s2509_s14 = int_to_ptr.vmem [resolvable:$false] %s2508_s14 }
  0x4e   : > { %s2510_s16 = scalar_lea.vmem %s2509_s14, 512  ;;  %p2511_p7 = scmp.lt.s32.totalorder %s230_s17, %s2509_s14 }
  0x4f   : > { %p2506_p5 = pnand %p2504_p0, %p2492_p1  ;;  %p2512_p9 = scmp.lt.s32.totalorder %s2510_s16, %s2503_s13 }
  0x51   : > { %p2507_p3 = pneg %p2506_p5  ;;  %p2513_p10 = por %p2512_p9, %p2511_p7 }
  0x53   : > { %p2514_p8 = pnand %p2513_p10, %p2507_p3 }
  0x55   : > { %2517 = shalt.err (!%p2514_p8)
}
  0x56   : > { %2334 = dma.hbm_to_vmem [thread:$0]  (!%p2741_p11), %s2739_s15, 256, %s230_s17, %s218_s27  }
  0x57   : > { %p3009_p13 = scmp.ne.s32.totalorder %s3004_s26, 0 }
  0x58   : > { %s2762_s28 = sand.u32 (!%p3009_p13), 1, %s2582_s19   ;;  %p3010_p8 = scmp.ne.s32.totalorder (!%p3009_p13), %s3002_s24, 0 }
  0x59   : > { %238 = sbr.rel (%p3009_p13) target bundleno = 1606 (0x646), region = 40  ;;  %s2217_s30 = sshll.u32 (!%p3009_p13), %s2762_s28, 4 }
  0x5a   : > { %s241_s7 = scalar_lea.sflag (!%p3009_p13), [#allocation3], %s2762_s28  ;;  %s2768_s9 = scalar_lea.vmem (!%p3009_p13), [#allocation2], %s2217_s30 }
  0x5e   : > { %2561 = dma.done.wait (%p3010_p8), %s241_s7, 256  }
  0x5f   : > { %2563 = vsyncadd (%p3010_p8), %s241_s7, 4294967040  ;;  %p3011_p10 = scmp.eq.s32.totalorder %s2657_s22, 0 }
  0x61   : > { %2565 = dma.done.wait (%p3011_p10), [#allocation6], 24672   ;;  %p3012_p11 = pmov %p3011_p10 }
  0x62   : > { %p3013_p1 = pmov %p3011_p10 }
  0x63   : > { %2567 = vsyncadd (%p3012_p11), [#allocation6], 4294942624 }
  0x64   : > { %2569 = dma.done.wait (%p3013_p1), [#allocation9], 8192   ;;  %p3014_p2 = pmov %p3013_p1 }
  0x65   : > { %v376_v0 = vld [vmem:[#allocation5 + $0x2d8] sm:$0xff]  ;;  %v378_v1 = vld [vmem:[#allocation5 + $0x2e8] sm:$0xff]  ;;  %v375_v2 = vld [vmem:[#allocation5 + $0x2d0] sm:$0xff]  ;;  %s2600_s24 = smov 64   ;;  %vm2602_vm0 = vmmov 0   ;;  %vm1156_vm1 = vcmask 523264  }
  0x66   : > { %2571 = vsyncadd (%p3014_p2), [#allocation9], 4294959104  ;;  %509 = vmatprep.subr.mxu0 %v376_v0  ;;  %580 = vmatprep.subr.mxu1 %v378_v1  ;;  %v377_v3 = vld [vmem:[#allocation5 + $0x2e0] sm:$0xff]  ;;  %v370_v4 = vld [vmem:[#allocation5 + $0x2a8] sm:$0xff]  ;;  %vm1461_vm2 = vcmask 64512   ;;  %s2248_s17 = sshll.u32 %s2657_s22, 8 }
  0x67   : > { %v372_v5 = vld [vmem:[#allocation5 + $0x2b8] sm:$0xff]  ;;  %510 = vmatpush1.msra.mxu0 %v375_v2  ;;  %581 = vmatpush1.msra.mxu1 %v377_v3  ;;  %v369_v6 = vld [vmem:[#allocation5 + $0x2a0] sm:$0xff]  ;;  %v371_v7 = vld [vmem:[#allocation5 + $0x2b0] sm:$0xff]  ;;  %s282_s23 = scalar_lea.vmem [#allocation10], %s2217_s30  ;;  %s2106_s13 = scalar_lea.hbm %s2997_s5, %s2248_s17 }
  0x68   : > { %v364_v8 = vld [vmem:[#allocation5 + $0x278] sm:$0xff]  ;;  %511 = vmatprep.subr.mxu0 %v370_v4  ;;  %582 = vmatprep.subr.mxu1 %v372_v5  ;;  %v366_v9 = vld [vmem:[#allocation5 + $0x288] sm:$0xff]  ;;  %v363_v10 = vld [vmem:[#allocation5 + $0x270] sm:$0xff]  ;;  %s2108_s27 = sshll.u32 %s282_s23, 4  ;;  %s2094_s29 = scalar_lea.sflag [#allocation4], %s2762_s28  ;;  %s2109_s27 = int_to_ptr.vmem [resolvable:$true] %s2108_s27 }
  0x69   : > { %v365_v11 = vld [vmem:[#allocation5 + $0x280] sm:$0xff]  ;;  %512 = vmatpush1.msra.mxu0 %v369_v6  ;;  %583 = vmatpush1.msra.mxu1 %v371_v7  ;;  %v358_v12 = vld [vmem:[#allocation5 + $0x248] sm:$0xff]  ;;  %v360_v13 = vld [vmem:[#allocation5 + $0x258] sm:$0xff]  ;;  %s2518_s14 = scalar_lea.vmem %s2109_s27, 256  ;;  %p3015_p6 = scmp.ne.s32.totalorder %s3007_s11, 0 }
  0x6a   : > { %513 = vmatprep.subr.mxu0 %v364_v8  ;;  %584 = vmatprep.subr.mxu1 %v366_v9  ;;  %v357_v14 = vld [vmem:[#allocation5 + $0x240] sm:$0xff]  ;;  %v359_v15 = vld [vmem:[#allocation5 + $0x250] sm:$0xff]  ;;  %v352_v16 = vld [vmem:[#allocation5 + $0x218] sm:$0xff]  ;;  %p2519_p4 = scmp.ne.s32.totalorder %s2109_s27, %s2518_s14  ;;  %s2605_s22 = smov [#allocation10]  }
  0x6b   : > { %514 = vmatpush1.msra.mxu0 %v363_v10  ;;  %585 = vmatpush1.msra.mxu1 %v365_v11  ;;  %v354_v17 = vld [vmem:[#allocation5 + $0x228] sm:$0xff]  ;;  %v351_v18 = vld [vmem:[#allocation5 + $0x210] sm:$0xff]  ;;  %v353_v19 = vld [vmem:[#allocation5 + $0x220] sm:$0xff]  ;;  %s2522_s16 = sshll.u32 %s2605_s22, 4  ;;  %s2523_s16 = int_to_ptr.vmem [resolvable:$false] %s2522_s16 }
  0x6c   : > { %515 = vmatprep.subr.mxu0 %v358_v12  ;;  %586 = vmatprep.subr.mxu1 %v360_v13  ;;  %v346_v20 = vld [vmem:[#allocation5 + $0x1e8] sm:$0xff]  ;;  %v348_v21 = vld [vmem:[#allocation5 + $0x1f8] sm:$0xff]  ;;  %v345_v22 = vld [vmem:[#allocation5 + $0x1e0] sm:$0xff]  ;;  %p2520_p12 = pnand %p2519_p4, %p3015_p6  ;;  %s2524_s30 = scalar_lea.vmem %s2523_s16, 512 }
  0x6d   : > { %516 = vmatpush1.msra.mxu0 %v357_v14  ;;  %587 = vmatpush1.msra.mxu1 %v359_v15  ;;  %v347_v23 = vld [vmem:[#allocation5 + $0x1f0] sm:$0xff]  ;;  %v340_v24 = vld [vmem:[#allocation5 + $0x1b8] sm:$0xff]  ;;  %v342_v25 = vld [vmem:[#allocation5 + $0x1c8] sm:$0xff]  ;;  %p2525_p5 = scmp.lt.s32.totalorder %s2109_s27, %s2523_s16  ;;  %p2526_p3 = scmp.lt.s32.totalorder %s2524_s30, %s2518_s14 }
  0x6e   : > { %517 = vmatprep.subr.mxu0 %v352_v16  ;;  %588 = vmatprep.subr.mxu1 %v354_v17  ;;  %v339_v26 = vld [vmem:[#allocation5 + $0x1b0] sm:$0xff]  ;;  %v341_v27 = vld [vmem:[#allocation5 + $0x1c0] sm:$0xff]  ;;  %v334_v28 = vld [vmem:[#allocation5 + $0x188] sm:$0xff]  ;;  %p2521_p0 = pneg %p2520_p12 }
  0x6f   : > { %518 = vmatpush1.msra.mxu0 %v351_v18  ;;  %589 = vmatpush1.msra.mxu1 %v353_v19  ;;  %v336_v29 = vld [vmem:[#allocation5 + $0x198] sm:$0xff]  ;;  %v333_v30 = vld [vmem:[#allocation5 + $0x180] sm:$0xff]  ;;  %v335_v31 = vld [vmem:[#allocation5 + $0x190] sm:$0xff]  ;;  %p2527_p7 = por %p2526_p3, %p2525_p5 }
  0x70   : > { %519 = vmatprep.subr.mxu0 %v346_v20  ;;  %590 = vmatprep.subr.mxu1 %v348_v21  ;;  %v328_v32 = vld [vmem:[#allocation5 + $0x158] sm:$0xff]  ;;  %v330_v33 = vld [vmem:[#allocation5 + $0x168] sm:$0xff]  ;;  %v327_v34 = vld [vmem:[#allocation5 + $0x150] sm:$0xff] }
  0x71   : > { %520 = vmatpush1.msra.mxu0 %v345_v22  ;;  %591 = vmatpush1.msra.mxu1 %v347_v23  ;;  %v329_v35 = vld [vmem:[#allocation5 + $0x160] sm:$0xff]  ;;  %v322_v36 = vld [vmem:[#allocation5 + $0x128] sm:$0xff]  ;;  %v324_v37 = vld [vmem:[#allocation5 + $0x138] sm:$0xff]  ;;  %p2528_p9 = pnand %p2527_p7, %p2521_p0 }
  0x72   : > { %521 = vmatprep.subr.mxu0 %v340_v24  ;;  %592 = vmatprep.subr.mxu1 %v342_v25  ;;  %v321_v38 = vld [vmem:[#allocation5 + $0x120] sm:$0xff]  ;;  %v323_v39 = vld [vmem:[#allocation5 + $0x130] sm:$0xff]  ;;  %v316_v40 = vld [vmem:[#allocation5 + $0xf8] sm:$0xff] }
  0x73   : > { %522 = vmatpush1.msra.mxu0 %v339_v26  ;;  %593 = vmatpush1.msra.mxu1 %v341_v27  ;;  %v318_v41 = vld [vmem:[#allocation5 + $0x108] sm:$0xff]  ;;  %v315_v42 = vld [vmem:[#allocation5 + $0xf0] sm:$0xff]  ;;  %v317_v43 = vld [vmem:[#allocation5 + $0x100] sm:$0xff] }
  0x74   : > { %523 = vmatprep.subr.mxu0 %v334_v28  ;;  %594 = vmatprep.subr.mxu1 %v336_v29  ;;  %v310_v44 = vld [vmem:[#allocation5 + $0xc8] sm:$0xff]  ;;  %v312_v45 = vld [vmem:[#allocation5 + $0xd8] sm:$0xff]  ;;  %v309_v46 = vld [vmem:[#allocation5 + $0xc0] sm:$0xff] }
  0x75   : > { %524 = vmatpush1.msra.mxu0 %v333_v30  ;;  %595 = vmatpush1.msra.mxu1 %v335_v31  ;;  %v311_v47 = vld [vmem:[#allocation5 + $0xd0] sm:$0xff]  ;;  %v304_v48 = vld [vmem:[#allocation5 + $0x98] sm:$0xff]  ;;  %v306_v49 = vld [vmem:[#allocation5 + $0xa8] sm:$0xff] }
  0x76   : > { %525 = vmatprep.subr.mxu0 %v328_v32  ;;  %596 = vmatprep.subr.mxu1 %v330_v33  ;;  %v303_v50 = vld [vmem:[#allocation5 + $0x90] sm:$0xff]  ;;  %v305_v51 = vld [vmem:[#allocation5 + $0xa0] sm:$0xff]  ;;  %v298_v52 = vld [vmem:[#allocation5 + $0x68] sm:$0xff] }
  0x77   : > { %526 = vmatpush1.msra.mxu0 %v327_v34  ;;  %597 = vmatpush1.msra.mxu1 %v329_v35  ;;  %v300_v53 = vld [vmem:[#allocation5 + $0x78] sm:$0xff]  ;;  %v297_v54 = vld [vmem:[#allocation5 + $0x60] sm:$0xff]  ;;  %v299_v55 = vld [vmem:[#allocation5 + $0x70] sm:$0xff] }
  0x78   : > { %527 = vmatprep.subr.mxu0 %v322_v36  ;;  %598 = vmatprep.subr.mxu1 %v324_v37  ;;  %v292_v56 = vld [vmem:[#allocation5 + $0x38] sm:$0xff]  ;;  %v294_v57 = vld [vmem:[#allocation5 + $0x48] sm:$0xff]  ;;  %v291_v58 = vld [vmem:[#allocation5 + $0x30] sm:$0xff] }
  0x79   : > { %528 = vmatpush1.msra.mxu0 %v321_v38  ;;  %599 = vmatpush1.msra.mxu1 %v323_v39  ;;  %v293_v59 = vld [vmem:[#allocation5 + $0x40] sm:$0xff]  ;;  %v286_v60 = vld [vmem:[#allocation5 + $0x8] sm:$0xff]  ;;  %v288_v61 = vld [vmem:[#allocation5 + $0x18] sm:$0xff] }
  0x7a   : > { %529 = vmatprep.subr.mxu0 %v316_v40  ;;  %600 = vmatprep.subr.mxu1 %v318_v41  ;;  %v285_v62 = vld [vmem:[#allocation5] sm:$0xff]  ;;  %v287_v63 = vld [vmem:[#allocation5 + $0x10] sm:$0xff]  ;;  %v472_v0 = vld [vmem:[#allocation5 + $0x5d8] sm:$0xff] }
  0x7b   : > { %530 = vmatpush1.msra.mxu0 %v315_v42  ;;  %601 = vmatpush1.msra.mxu1 %v317_v43  ;;  %v474_v1 = vld [vmem:[#allocation5 + $0x5e8] sm:$0xff]  ;;  %v471_v2 = vld [vmem:[#allocation5 + $0x5d0] sm:$0xff]  ;;  %v473_v3 = vld [vmem:[#allocation5 + $0x5e0] sm:$0xff] }
  0x7c   : > { %531 = vmatprep.subr.mxu0 %v310_v44  ;;  %602 = vmatprep.subr.mxu1 %v312_v45  ;;  %v466_v4 = vld [vmem:[#allocation5 + $0x5a8] sm:$0xff]  ;;  %v468_v5 = vld [vmem:[#allocation5 + $0x5b8] sm:$0xff]  ;;  %v465_v6 = vld [vmem:[#allocation5 + $0x5a0] sm:$0xff] }
  0x7d   : > { %532 = vmatpush1.msra.mxu0 %v309_v46  ;;  %603 = vmatpush1.msra.mxu1 %v311_v47  ;;  %v467_v7 = vld [vmem:[#allocation5 + $0x5b0] sm:$0xff]  ;;  %v460_v8 = vld [vmem:[#allocation5 + $0x578] sm:$0xff]  ;;  %v462_v9 = vld [vmem:[#allocation5 + $0x588] sm:$0xff] }
  0x7e   : > { %533 = vmatprep.subr.mxu0 %v304_v48  ;;  %604 = vmatprep.subr.mxu1 %v306_v49  ;;  %v459_v10 = vld [vmem:[#allocation5 + $0x570] sm:$0xff]  ;;  %v461_v11 = vld [vmem:[#allocation5 + $0x580] sm:$0xff]  ;;  %v454_v12 = vld [vmem:[#allocation5 + $0x548] sm:$0xff] }
  0x7f   : > { %534 = vmatpush1.msra.mxu0 %v303_v50  ;;  %605 = vmatpush1.msra.mxu1 %v305_v51  ;;  %v456_v13 = vld [vmem:[#allocation5 + $0x558] sm:$0xff]  ;;  %v453_v14 = vld [vmem:[#allocation5 + $0x540] sm:$0xff]  ;;  %v455_v15 = vld [vmem:[#allocation5 + $0x550] sm:$0xff] }
  0x80   : > { %535 = vmatprep.subr.mxu0 %v298_v52  ;;  %606 = vmatprep.subr.mxu1 %v300_v53  ;;  %v448_v16 = vld [vmem:[#allocation5 + $0x518] sm:$0xff]  ;;  %v450_v17 = vld [vmem:[#allocation5 + $0x528] sm:$0xff]  ;;  %v447_v18 = vld [vmem:[#allocation5 + $0x510] sm:$0xff] }
  0x81   : > { %536 = vmatpush1.msra.mxu0 %v297_v54  ;;  %607 = vmatpush1.msra.mxu1 %v299_v55  ;;  %v449_v19 = vld [vmem:[#allocation5 + $0x520] sm:$0xff]  ;;  %v442_v20 = vld [vmem:[#allocation5 + $0x4e8] sm:$0xff]  ;;  %v444_v21 = vld [vmem:[#allocation5 + $0x4f8] sm:$0xff] }
  0x82   : > { %537 = vmatprep.subr.mxu0 %v292_v56  ;;  %608 = vmatprep.subr.mxu1 %v294_v57  ;;  %v441_v22 = vld [vmem:[#allocation5 + $0x4e0] sm:$0xff]  ;;  %v443_v23 = vld [vmem:[#allocation5 + $0x4f0] sm:$0xff]  ;;  %v436_v24 = vld [vmem:[#allocation5 + $0x4b8] sm:$0xff] }
  0x83   : > { %538 = vmatpush1.msra.mxu0 %v291_v58  ;;  %609 = vmatpush1.msra.mxu1 %v293_v59  ;;  %v438_v25 = vld [vmem:[#allocation5 + $0x4c8] sm:$0xff]  ;;  %v435_v26 = vld [vmem:[#allocation5 + $0x4b0] sm:$0xff]  ;;  %v437_v27 = vld [vmem:[#allocation5 + $0x4c0] sm:$0xff] }
  0x84   : > { %539 = vmatprep.subr.mxu0 %v286_v60  ;;  %610 = vmatprep.subr.mxu1 %v288_v61  ;;  %v430_v28 = vld [vmem:[#allocation5 + $0x488] sm:$0xff]  ;;  %v432_v29 = vld [vmem:[#allocation5 + $0x498] sm:$0xff]  ;;  %v429_v30 = vld [vmem:[#allocation5 + $0x480] sm:$0xff] }
  0x85   : > { %540 = vmatpush1.msra.mxu0 %v285_v62  ;;  %611 = vmatpush1.msra.mxu1 %v287_v63  ;;  %v431_v31 = vld [vmem:[#allocation5 + $0x490] sm:$0xff]  ;;  %v424_v32 = vld [vmem:[#allocation5 + $0x458] sm:$0xff]  ;;  %v426_v33 = vld [vmem:[#allocation5 + $0x468] sm:$0xff] }
  0x86   : > { %541 = vmatprep.subr.mxu0 %v472_v0  ;;  %612 = vmatprep.subr.mxu1 %v474_v1  ;;  %v423_v34 = vld [vmem:[#allocation5 + $0x450] sm:$0xff]  ;;  %v425_v35 = vld [vmem:[#allocation5 + $0x460] sm:$0xff]  ;;  %v418_v36 = vld [vmem:[#allocation5 + $0x428] sm:$0xff] }
  0x87   : > { %542 = vmatpush2.msra.mxu0 %v471_v2  ;;  %613 = vmatpush2.msra.mxu1 %v473_v3  ;;  %v420_v37 = vld [vmem:[#allocation5 + $0x438] sm:$0xff]  ;;  %v417_v38 = vld [vmem:[#allocation5 + $0x420] sm:$0xff]  ;;  %v419_v39 = vld [vmem:[#allocation5 + $0x430] sm:$0xff] }
  0x88   : > { %543 = vmatprep.subr.mxu0 %v466_v4  ;;  %614 = vmatprep.subr.mxu1 %v468_v5  ;;  %v412_v40 = vld [vmem:[#allocation5 + $0x3f8] sm:$0xff]  ;;  %v414_v41 = vld [vmem:[#allocation5 + $0x408] sm:$0xff]  ;;  %v411_v42 = vld [vmem:[#allocation5 + $0x3f0] sm:$0xff] }
  0x89   : > { %544 = vmatpush2.msra.mxu0 %v465_v6  ;;  %615 = vmatpush2.msra.mxu1 %v467_v7  ;;  %v413_v43 = vld [vmem:[#allocation5 + $0x400] sm:$0xff]  ;;  %v406_v44 = vld [vmem:[#allocation5 + $0x3c8] sm:$0xff]  ;;  %v408_v45 = vld [vmem:[#allocation5 + $0x3d8] sm:$0xff] }
  0x8a   : > { %545 = vmatprep.subr.mxu0 %v460_v8  ;;  %616 = vmatprep.subr.mxu1 %v462_v9  ;;  %v405_v46 = vld [vmem:[#allocation5 + $0x3c0] sm:$0xff]  ;;  %v407_v47 = vld [vmem:[#allocation5 + $0x3d0] sm:$0xff]  ;;  %v400_v48 = vld [vmem:[#allocation5 + $0x398] sm:$0xff] }
  0x8b   : > { %546 = vmatpush2.msra.mxu0 %v459_v10  ;;  %617 = vmatpush2.msra.mxu1 %v461_v11  ;;  %v402_v49 = vld [vmem:[#allocation5 + $0x3a8] sm:$0xff]  ;;  %v399_v50 = vld [vmem:[#allocation5 + $0x390] sm:$0xff]  ;;  %v401_v51 = vld [vmem:[#allocation5 + $0x3a0] sm:$0xff] }
  0x8c   : > { %547 = vmatprep.subr.mxu0 %v454_v12  ;;  %618 = vmatprep.subr.mxu1 %v456_v13  ;;  %v394_v52 = vld [vmem:[#allocation5 + $0x368] sm:$0xff]  ;;  %v396_v53 = vld [vmem:[#allocation5 + $0x378] sm:$0xff]  ;;  %v393_v54 = vld [vmem:[#allocation5 + $0x360] sm:$0xff] }
  0x8d   : > { %548 = vmatpush2.msra.mxu0 %v453_v14  ;;  %619 = vmatpush2.msra.mxu1 %v455_v15  ;;  %v395_v55 = vld [vmem:[#allocation5 + $0x370] sm:$0xff]  ;;  %v388_v56 = vld [vmem:[#allocation5 + $0x338] sm:$0xff]  ;;  %v390_v57 = vld [vmem:[#allocation5 + $0x348] sm:$0xff] }
  0x8e   : > { %549 = vmatprep.subr.mxu0 %v448_v16  ;;  %620 = vmatprep.subr.mxu1 %v450_v17  ;;  %v387_v58 = vld [vmem:[#allocation5 + $0x330] sm:$0xff]  ;;  %v389_v59 = vld [vmem:[#allocation5 + $0x340] sm:$0xff]  ;;  %v382_v60 = vld [vmem:[#allocation5 + $0x308] sm:$0xff] }
  0x8f   : > { %550 = vmatpush2.msra.mxu0 %v447_v18  ;;  %621 = vmatpush2.msra.mxu1 %v449_v19  ;;  %v384_v61 = vld [vmem:[#allocation5 + $0x318] sm:$0xff]  ;;  %v381_v62 = vld [vmem:[#allocation5 + $0x300] sm:$0xff]  ;;  %v383_v0 = vld [vmem:[#allocation5 + $0x310] sm:$0xff] }
  0x90   : > { %551 = vmatprep.subr.mxu0 %v442_v20  ;;  %622 = vmatprep.subr.mxu1 %v444_v21  ;;  %v284_v63 = vld [vmem:[%s2768_s9 + $0x8] sm:$0xff]  ;;  %v2784_v1 = vld [vmem:[%s2768_s9] sm:$0xff] }
  0x91   : > { %552 = vmatpush2.msra.mxu0 %v441_v22  ;;  %623 = vmatpush2.msra.mxu1 %v443_v23  ;;  %v380_v2 = vld [vmem:[#allocation5 + $0x2f8] sm:$0xff]  ;;  %v379_v3 = vld [vmem:[#allocation5 + $0x2f0] sm:$0xff]  ;;  %v374_v4 = vld [vmem:[#allocation5 + $0x2c8] sm:$0xff] }
  0x92   : > { %553 = vmatprep.subr.mxu0 %v436_v24  ;;  %624 = vmatprep.subr.mxu1 %v438_v25  ;;  %v373_v5 = vld [vmem:[#allocation5 + $0x2c0] sm:$0xff]  ;;  %v368_v6 = vld [vmem:[#allocation5 + $0x298] sm:$0xff]  ;;  %v367_v7 = vld [vmem:[#allocation5 + $0x290] sm:$0xff] }
  0x93   : > { %554 = vmatpush2.msra.mxu0 %v435_v26  ;;  %625 = vmatpush2.msra.mxu1 %v437_v27  ;;  %v362_v8 = vld [vmem:[#allocation5 + $0x268] sm:$0xff]  ;;  %v361_v9 = vld [vmem:[#allocation5 + $0x260] sm:$0xff]  ;;  %v356_v10 = vld [vmem:[#allocation5 + $0x238] sm:$0xff] }
  0x94   : > { %555 = vmatprep.subr.mxu0 %v430_v28  ;;  %626 = vmatprep.subr.mxu1 %v432_v29  ;;  %v355_v11 = vld [vmem:[#allocation5 + $0x230] sm:$0xff]  ;;  %v350_v12 = vld [vmem:[#allocation5 + $0x208] sm:$0xff]  ;;  %v349_v13 = vld [vmem:[#allocation5 + $0x200] sm:$0xff] }
  0x95   : > { %556 = vmatpush2.msra.mxu0 %v429_v30  ;;  %627 = vmatpush2.msra.mxu1 %v431_v31  ;;  %v344_v14 = vld [vmem:[#allocation5 + $0x1d8] sm:$0xff]  ;;  %v343_v15 = vld [vmem:[#allocation5 + $0x1d0] sm:$0xff]  ;;  %v338_v16 = vld [vmem:[#allocation5 + $0x1a8] sm:$0xff] }
  0x96   : > { %557 = vmatprep.subr.mxu0 %v424_v32  ;;  %628 = vmatprep.subr.mxu1 %v426_v33  ;;  %v337_v17 = vld [vmem:[#allocation5 + $0x1a0] sm:$0xff]  ;;  %v332_v18 = vld [vmem:[#allocation5 + $0x178] sm:$0xff]  ;;  %v331_v19 = vld [vmem:[#allocation5 + $0x170] sm:$0xff] }
  0x97   : > { %558 = vmatpush2.msra.mxu0 %v423_v34  ;;  %629 = vmatpush2.msra.mxu1 %v425_v35  ;;  %v326_v20 = vld [vmem:[#allocation5 + $0x148] sm:$0xff]  ;;  %v325_v21 = vld [vmem:[#allocation5 + $0x140] sm:$0xff]  ;;  %v320_v22 = vld [vmem:[#allocation5 + $0x118] sm:$0xff] }
  0x98   : > { %559 = vmatprep.subr.mxu0 %v418_v36  ;;  %630 = vmatprep.subr.mxu1 %v420_v37  ;;  %v319_v23 = vld [vmem:[#allocation5 + $0x110] sm:$0xff]  ;;  %v314_v24 = vld [vmem:[#allocation5 + $0xe8] sm:$0xff]  ;;  %v313_v25 = vld [vmem:[#allocation5 + $0xe0] sm:$0xff] }
  0x99   : > { %560 = vmatpush2.msra.mxu0 %v417_v38  ;;  %631 = vmatpush2.msra.mxu1 %v419_v39  ;;  %v308_v26 = vld [vmem:[#allocation5 + $0xb8] sm:$0xff]  ;;  %v307_v27 = vld [vmem:[#allocation5 + $0xb0] sm:$0xff]  ;;  %v302_v28 = vld [vmem:[#allocation5 + $0x88] sm:$0xff] }
  0x9a   : > { %561 = vmatprep.subr.mxu0 %v412_v40  ;;  %632 = vmatprep.subr.mxu1 %v414_v41  ;;  %v301_v29 = vld [vmem:[#allocation5 + $0x80] sm:$0xff]  ;;  %v296_v30 = vld [vmem:[#allocation5 + $0x58] sm:$0xff]  ;;  %v295_v31 = vld [vmem:[#allocation5 + $0x50] sm:$0xff] }
  0x9b   : > { %562 = vmatpush2.msra.mxu0 %v411_v42  ;;  %633 = vmatpush2.msra.mxu1 %v413_v43  ;;  %v290_v32 = vld [vmem:[#allocation5 + $0x28] sm:$0xff]  ;;  %v289_v33 = vld [vmem:[#allocation5 + $0x20] sm:$0xff]  ;;  %v476_v34 = vld [vmem:[#allocation5 + $0x5f8] sm:$0xff] }
  0x9c   : > { %563 = vmatprep.subr.mxu0 %v406_v44  ;;  %634 = vmatprep.subr.mxu1 %v408_v45  ;;  %v475_v35 = vld [vmem:[#allocation5 + $0x5f0] sm:$0xff]  ;;  %v470_v36 = vld [vmem:[#allocation5 + $0x5c8] sm:$0xff]  ;;  %v469_v37 = vld [vmem:[#allocation5 + $0x5c0] sm:$0xff]  ;;  %v479_v45 = vlaneseq }
  0x9d   : > { %564 = vmatpush2.msra.mxu0 %v405_v46  ;;  %635 = vmatpush2.msra.mxu1 %v407_v47  ;;  %v464_v38 = vld [vmem:[#allocation5 + $0x598] sm:$0xff]  ;;  %v463_v39 = vld [vmem:[#allocation5 + $0x590] sm:$0xff]  ;;  %v458_v40 = vld [vmem:[#allocation5 + $0x568] sm:$0xff] }
  0x9e   : > { %565 = vmatprep.subr.mxu0 %v400_v48  ;;  %636 = vmatprep.subr.mxu1 %v402_v49  ;;  %v457_v41 = vld [vmem:[#allocation5 + $0x560] sm:$0xff]  ;;  %v452_v42 = vld [vmem:[#allocation5 + $0x538] sm:$0xff]  ;;  %v451_v43 = vld [vmem:[#allocation5 + $0x530] sm:$0xff]  ;;  %v2788_v48 = vshrl.u32 %v479_v45, 7 }
  0x9f   : > { %566 = vmatpush2.msra.mxu0 %v399_v50  ;;  %637 = vmatpush2.msra.mxu1 %v401_v51  ;;  %v446_v44 = vld [vmem:[#allocation5 + $0x508] sm:$0xff]  ;;  %v445_v46 = vld [vmem:[#allocation5 + $0x500] sm:$0xff]  ;;  %v440_v47 = vld [vmem:[#allocation5 + $0x4d8] sm:$0xff] }
  0xa0   : > { %567 = vmatprep.subr.mxu0 %v394_v52  ;;  %638 = vmatprep.subr.mxu1 %v396_v53  ;;  %v439_v49 = vld [vmem:[#allocation5 + $0x4d0] sm:$0xff]  ;;  %v434_v50 = vld [vmem:[#allocation5 + $0x4a8] sm:$0xff]  ;;  %v433_v51 = vld [vmem:[#allocation5 + $0x4a0] sm:$0xff]  ;;  %v481_v53 = vsub.s32 0, %v2788_v48 }
  0xa1   : > { %568 = vmatpush2.msra.mxu0 %v393_v54  ;;  %639 = vmatpush2.msra.mxu1 %v395_v55  ;;  %v428_v52 = vld [vmem:[#allocation5 + $0x478] sm:$0xff]  ;;  %v489_v54 = vsub.s32 2, %v2788_v48  ;;  %v427_v55 = vld [vmem:[#allocation5 + $0x470] sm:$0xff] }
  0xa2   : > { %569 = vmatprep.subr.mxu0 %v388_v56  ;;  %640 = vmatprep.subr.mxu1 %v390_v57  ;;  %v2792_v56 = vld [vmem:[#allocation7] sm:$0x3f]  ;;  %v485_v57 = vsub.s32 1, %v2788_v48 }
  0xa3   : > { %570 = vmatpush2.msra.mxu0 %v387_v58  ;;  %641 = vmatpush2.msra.mxu1 %v389_v59  ;;  %v493_v58 = vsub.s32 3, %v2788_v48  ;;  %v422_v59 = vld [vmem:[#allocation5 + $0x448] sm:$0xff] }
  0xa4   : > { %571 = vmatprep.subr.mxu0 %v382_v60  ;;  %642 = vmatprep.subr.mxu1 %v384_v61  ;;  %v421_v60 = vld [vmem:[#allocation5 + $0x440] sm:$0xff]  ;;  %v482_v61 = vrot.slane %v2792_v56, %v481_v53 }
  0xa5   : > { %572 = vmatpush2.msra.mxu0 %v381_v62  ;;  %573 = vmatprep.mubr.f32.mxu0 %v284_v63  ;;  %v490_v62 = vrot.slane %v2792_v56, %v489_v54 }
  0xa6   : > { %643 = vmatpush2.msra.mxu1 %v383_v0  ;;  %644 = vmatprep.mubr.f32.mxu1 %v284_v63  ;;  %v415_v0 = vld [vmem:[#allocation5 + $0x410] sm:$0xff] }
  0xa7   : > { %574 = vmatmul.mubr.f32.vlgmr.msra.gmra.mxu0 %v2784_v1  ;;  %645 = vmatmul.mubr.f32.vlgmr.msra.gmra.mxu1 %v2784_v1 }
  0xa8   : > { %715 = vmatprep.mubr.f32.mxu0 %v284_v63  ;;  %651 = vmatprep.subr.mxu0 %v380_v2  ;;  %v416_v63 = vld [vmem:[#allocation5 + $0x418] sm:$0xff]  ;;  %v486_v2 = vrot.slane %v2792_v56, %v485_v57 }
  0xa9   : > { %652 = vmatpush1.msra.mxu0 %v379_v3  ;;  %v494_v3 = vrot.slane %v2792_v56, %v493_v58 }
  0xaa   : > { %653 = vmatprep.subr.mxu0 %v374_v4  ;;  %v410_v4 = vld [vmem:[#allocation5 + $0x3e8] sm:$0xff] }
  0xab   : > { %654 = vmatpush1.msra.mxu0 %v373_v5 }
  0xac   : > { %655 = vmatprep.subr.mxu0 %v368_v6 }
  0xad   : > { %656 = vmatpush1.msra.mxu0 %v367_v7  ;;  %v409_v7 = vld [vmem:[#allocation5 + $0x3e0] sm:$0xff] }
  0xae   : > { %657 = vmatprep.subr.mxu0 %v362_v8 }
  0xaf   : > { %658 = vmatpush1.msra.mxu0 %v361_v9 }
  0xb0   : > { %659 = vmatprep.subr.mxu0 %v356_v10  ;;  %v404_v10 = vld [vmem:[#allocation5 + $0x3b8] sm:$0xff] }
  0xb1   : > { %660 = vmatpush1.msra.mxu0 %v355_v11 }
  0xb2   : > { %661 = vmatprep.subr.mxu0 %v350_v12 }
  0xb3   : > { %662 = vmatpush1.msra.mxu0 %v349_v13  ;;  %v403_v13 = vld [vmem:[#allocation5 + $0x3b0] sm:$0xff] }
  0xb4   : > { %663 = vmatprep.subr.mxu0 %v344_v14 }
  0xb5   : > { %664 = vmatpush1.msra.mxu0 %v343_v15 }
  0xb6   : > { %665 = vmatprep.subr.mxu0 %v338_v16 }
  0xb7   : > { %666 = vmatpush1.msra.mxu0 %v337_v17  ;;  %v398_v17 = vld [vmem:[#allocation5 + $0x388] sm:$0xff] }
  0xb8   : > { %667 = vmatprep.subr.mxu0 %v332_v18  ;;  %v397_v18 = vld [vmem:[#allocation5 + $0x380] sm:$0xff] }
  0xb9   : > { %668 = vmatpush1.msra.mxu0 %v331_v19 }
  0xba   : > { %669 = vmatprep.subr.mxu0 %v326_v20 }
  0xbb   : > { %670 = vmatpush1.msra.mxu0 %v325_v21 }
  0xbc   : > { %671 = vmatprep.subr.mxu0 %v320_v22  ;;  %v392_v22 = vld [vmem:[#allocation5 + $0x358] sm:$0xff] }
  0xbd   : > { %672 = vmatpush1.msra.mxu0 %v319_v23  ;;  %v391_v23 = vld [vmem:[#allocation5 + $0x350] sm:$0xff] }
  0xbe   : > { %673 = vmatprep.subr.mxu0 %v314_v24 }
  0xbf   : > { %674 = vmatpush1.msra.mxu0 %v313_v25 }
  0xc0   : > { %675 = vmatprep.subr.mxu0 %v308_v26  ;;  %v386_v26 = vld [vmem:[#allocation5 + $0x328] sm:$0xff] }
  0xc1   : > { %676 = vmatpush1.msra.mxu0 %v307_v27  ;;  %v385_v27 = vld [vmem:[#allocation5 + $0x320] sm:$0xff] }
  0xc2   : > { %677 = vmatprep.subr.mxu0 %v302_v28  ;;  %v2601_v28 = vmov 0.0  }
  0xc3   : > { %678 = vmatpush1.msra.mxu0 %v301_v29  ;;  %2285 = vmatprep.subr.mxu1 %v2601_v28  ;;  %v2603_v29 = vmov 1983009808  }
  0xc4   : > { %679 = vmatprep.subr.mxu0 %v296_v30  ;;  %2287 = vmatprep.mubr.msk.f32.mxu1 %vm2602_vm0, %v2601_v28  ;;  %v735_v30 = vunpack.c.l.s4 %v2603_v29 }
  0xc5   : > { %680 = vmatpush1.msra.mxu0 %v295_v31 }
  0xc6   : > { %681 = vmatprep.subr.mxu0 %v290_v32  ;;  %v736_v31 = vunpack.c.0.s8 %v735_v30  ;;  %v2604_v32 = vmov 1934713408  }
  0xc7   : > { %682 = vmatpush1.msra.mxu0 %v289_v33  ;;  %v767_v33 = vunpack.c.l.s4 %v2604_v32 }
  0xc8   : > { %683 = vmatprep.subr.mxu0 %v476_v34 }
  0xc9   : > { %684 = vmatpush2.msra.mxu0 %v475_v35  ;;  %v2816_v35 = vsub.s32 %v736_v31, %v2788_v48 }
  0xca   : > { %685 = vmatprep.subr.mxu0 %v470_v36  ;;  %v768_v36 = vunpack.c.0.s8 %v767_v33 }
  0xcb   : > { %686 = vmatpush2.msra.mxu0 %v469_v37 }
  0xcc   : > { %687 = vmatprep.subr.mxu0 %v464_v38 }
  0xcd   : > { %688 = vmatpush2.msra.mxu0 %v463_v39 }
  0xce   : > { %689 = vmatprep.subr.mxu0 %v458_v40  ;;  %v2819_v40 = vsub.s32 %v768_v36, %v2788_v48 }
  0xcf   : > { %690 = vmatpush2.msra.mxu0 %v457_v41 }
  0xd0   : > { %691 = vmatprep.subr.mxu0 %v452_v42 }
  0xd1   : > { %692 = vmatpush2.msra.mxu0 %v451_v43 }
  0xd2   : > { %693 = vmatprep.subr.mxu0 %v446_v44 }
  0xd3   : > { %694 = vmatpush2.msra.mxu0 %v445_v46 }
  0xd4   : > { %695 = vmatprep.subr.mxu0 %v440_v47 }
  0xd5   : > { %696 = vmatpush2.msra.mxu0 %v439_v49 }
  0xd6   : > { %697 = vmatprep.subr.mxu0 %v434_v50 }
  0xd7   : > { %698 = vmatpush2.msra.mxu0 %v433_v51 }
  0xd8   : > { %699 = vmatprep.subr.mxu0 %v428_v52 }
  0xd9   : > { %700 = vmatpush2.msra.mxu0 %v427_v55 }
  0xda   : > { %701 = vmatprep.subr.mxu0 %v422_v59 }
  0xdb   : > { %702 = vmatpush2.msra.mxu0 %v421_v60 }
  0xdc   : > { %703 = vmatprep.subr.mxu0 %v416_v63 }
  0xdd   : > { %704 = vmatpush2.msra.mxu0 %v415_v0 }
  0xde   : > { %705 = vmatprep.subr.mxu0 %v410_v4 }
  0xdf   : > { %706 = vmatpush2.msra.mxu0 %v409_v7 }
  0xe0   : > { %707 = vmatprep.subr.mxu0 %v404_v10 }
  0xe1   : > { %708 = vmatpush2.msra.mxu0 %v403_v13 }
  0xe2   : > { %709 = vmatprep.subr.mxu0 %v398_v17 }
  0xe3   : > { %710 = vmatpush2.msra.mxu0 %v397_v18 }
  0xe4   : > { %711 = vmatprep.subr.mxu0 %v392_v22 }
  0xe5   : > { %712 = vmatpush2.msra.mxu0 %v391_v23 }
  0xe6   : > { %713 = vmatprep.subr.mxu0 %v386_v26 }
  0xe7   : > { %714 = vmatpush2.msra.mxu0 %v385_v27 }
  0xe8   : > { %716 = vmatmul.mubr.f32.vlgmr.msra.gmra.mxu0 %v2784_v1  ;;  %2265 = vmatprep.subr.mxu0 %v2601_v28 }
  0xe9   : > { %2267 = vmatprep.mubr.msk.f32.mxu0 %vm2602_vm0, %v2601_v28 }
 0x167   : > { %v575_v5 = vpop.f32.mrf.mxu0  ;;  %v646_v6 = vpop.f32.mrf.mxu1 }
 0x168   : > { %v576_v8 = vadd.f32 %v575_v5, %v482_v61  ;;  %v647_v9 = vadd.f32 %v646_v6, %v490_v62 }
 0x169   : > { %v577_v11 = vpop.f32.mrf.mxu0  ;;  %v648_v12 = vpop.f32.mrf.mxu1 }
 0x16a   : > { %v722_v14 = vmul.f32 0.125, %v576_v8  ;;  %v578_v15 = vadd.f32 %v577_v11, %v486_v2  ;;  %v649_v16 = vadd.f32 %v648_v12, %v494_v3  ;;  %869 = vrot.lane.b32.xlu0 %v647_v9, %s2600_s24 }
 0x16c   : > { %v723_v19 = vmul.f32 0.125, %v578_v15  ;;  %v876_v20 = vcombine.low %v647_v9, %v649_v16  ;;  %v877_v21 = vcombine.high %v647_v9, %v649_v16  ;;  %725 = vrot.lane.b32.xlu1 %v722_v14, %s2600_s24 }
 0x16e   : > { %v732_v24 = vcombine.low %v722_v14, %v723_v19  ;;  %v733_v25 = vcombine.high %v722_v14, %v723_v19  ;;  %873 = vrot.lane.b32.xlu0 %v649_v16, %s2600_s24  ;;  %v884_v41 = vrot.slane %v876_v20, %v2816_v35  ;;  %v891_v42 = vrot.slane %v877_v21, %v2816_v35 }
 0x170   : > { %729 = vrot.lane.b32.xlu1 %v723_v19, %s2600_s24  ;;  %v740_v54 = vrot.slane %v732_v24, %v2816_v35  ;;  %v747_v55 = vrot.slane %v733_v25, %v2816_v35 }
 0x1dc   : > { %v870_v34 = vpop.permute.xlu0 %869 }
 0x1de   : > { %v726_v1 = vpop.permute.xlu1 %725 }
 0x1e0   : > { %v874_v37 = vpop.permute.xlu0 %873 }
 0x1e1   : > { %v892_v38 = vcombine.low %v870_v34, %v874_v37  ;;  %v893_v39 = vcombine.high %v870_v34, %v874_v37 }
 0x1e2   : > { %v730_v43 = vpop.permute.xlu1 %729 }
 0x1e3   : > { %v900_v44 = vrot.slane %v892_v38, %v2816_v35  ;;  %v907_v45 = vrot.slane %v893_v39, %v2816_v35  ;;  %v748_v46 = vcombine.low %v726_v1, %v730_v43  ;;  %v749_v47 = vcombine.high %v726_v1, %v730_v43 }
 0x1e5   : > { %v908_v49 = vcombine.low %v884_v41, %v900_v44  ;;  %v909_v50 = vcombine.high %v884_v41, %v900_v44  ;;  %v924_v51 = vcombine.low %v891_v42, %v907_v45  ;;  %v925_v52 = vcombine.high %v891_v42, %v907_v45 }
 0x1e6   : > { %v756_v58 = vrot.slane %v748_v46, %v2816_v35  ;;  %v763_v59 = vrot.slane %v749_v47, %v2816_v35 }
 0x1e7   : > { %v916_v60 = vrot.slane %v908_v49, %v2819_v40  ;;  %v923_v61 = vrot.slane %v909_v50, %v2819_v40  ;;  %v932_v62 = vrot.slane %v924_v51, %v2819_v40  ;;  %v939_v63 = vrot.slane %v925_v52, %v2819_v40  ;;  %v717_v52 = vpop.f32.mrf.mxu0 }
 0x1e8   : > { %v764_v0 = vcombine.low %v740_v54, %v756_v58  ;;  %v765_v2 = vcombine.high %v740_v54, %v756_v58  ;;  %v780_v3 = vcombine.low %v747_v55, %v763_v59  ;;  %v781_v4 = vcombine.high %v747_v55, %v763_v59 }
 0x1e9   : > { %v944_v5 = vcombine.low %v916_v60, %v923_v61  ;;  %v2224_v6 = vcombine.high %v916_v60, %v923_v61  ;;  %v960_v7 = vcombine.low %v932_v62, %v939_v63  ;;  %v2225_v8 = vcombine.high %v932_v62, %v939_v63  ;;  %v719_v54 = vpop.f32.mrf.mxu0 }
 0x1ea   : > { %v772_v9 = vrot.slane %v764_v0, %v2819_v40  ;;  %v779_v10 = vrot.slane %v765_v2, %v2819_v40  ;;  %v788_v11 = vrot.slane %v780_v3, %v2819_v40  ;;  %v795_v12 = vrot.slane %v781_v4, %v2819_v40 }
 0x1eb   : > { %v951_v13 = vrot.slane %v944_v5, %v2816_v35  ;;  %v959_v14 = vrot.slane %v2224_v6, %v2816_v35  ;;  %v967_v15 = vrot.slane %v960_v7, %v2816_v35  ;;  %v975_v16 = vrot.slane %v2225_v8, %v2816_v35 }
 0x1ec   : > { %v800_v17 = vcombine.low %v772_v9, %v779_v10  ;;  %v2222_v18 = vcombine.high %v772_v9, %v779_v10  ;;  %v816_v19 = vcombine.low %v788_v11, %v795_v12  ;;  %v2223_v20 = vcombine.high %v788_v11, %v795_v12 }
 0x1ed   : > { %v976_v21 = vcombine.low %v951_v13, %v959_v14  ;;  %v977_v22 = vcombine.high %v951_v13, %v959_v14  ;;  %v992_v23 = vcombine.low %v967_v15, %v975_v16  ;;  %v993_v24 = vcombine.high %v967_v15, %v975_v16 }
 0x1ee   : > { %v807_v25 = vrot.slane %v800_v17, %v2816_v35  ;;  %v815_v26 = vrot.slane %v2222_v18, %v2816_v35  ;;  %v823_v27 = vrot.slane %v816_v19, %v2816_v35  ;;  %v831_v29 = vrot.slane %v2223_v20, %v2816_v35 }
 0x1ef   : > { %v984_v30 = vrot.slane %v976_v21, %v2819_v40  ;;  %v1000_v31 = vrot.slane %v992_v23, %v2819_v40  ;;  %v991_v32 = vrot.slane %v977_v22, %v2819_v40  ;;  %v1007_v33 = vrot.slane %v993_v24, %v2819_v40 }
 0x1f0   : > { %v832_v34 = vcombine.low %v807_v25, %v815_v26  ;;  %v833_v36 = vcombine.high %v807_v25, %v815_v26  ;;  %v848_v1 = vcombine.low %v823_v27, %v831_v29  ;;  %v849_v37 = vcombine.high %v823_v27, %v831_v29 }
 0x1f1   : > { %v1008_v38 = vcombine.low %v984_v30, %v1000_v31  ;;  %v1009_v39 = vcombine.high %v984_v30, %v1000_v31  ;;  %v1010_v41 = vcombine.low %v991_v32, %v1007_v33  ;;  %v1011_v42 = vcombine.high %v991_v32, %v1007_v33 }
 0x1f2   : > { %v840_v43 = vrot.slane %v832_v34, %v2819_v40  ;;  %v856_v44 = vrot.slane %v848_v1, %v2819_v40  ;;  %v847_v45 = vrot.slane %v833_v36, %v2819_v40  ;;  %v863_v46 = vrot.slane %v849_v37, %v2819_v40 }
 0x1f3   : > { %2266 = vmatpush3.xpose.msk.msra.mxu0 %vm1156_vm1, %v1008_v38  ;;  %v501_v16 = vsub.s32 5, %v2788_v48  ;;  %v497_v19 = vsub.s32 4, %v2788_v48 }
 0x1f4   : > { %v864_v47 = vcombine.low %v840_v43, %v856_v44  ;;  %2270 = vmatprep.subr.mxu0 %v2601_v28  ;;  %v865_v49 = vcombine.high %v840_v43, %v856_v44  ;;  %v866_v50 = vcombine.low %v847_v45, %v863_v46  ;;  %v867_v51 = vcombine.high %v847_v45, %v863_v46 }
 0x1f5   : > { %v502_v17 = vrot.slane %v2792_v56, %v501_v16  ;;  %v498_v20 = vrot.slane %v2792_v56, %v497_v19 }
 0x1f6   : > { %2268 = vmatmul.mubr.msk.f32.vlgmr.msra.gmra.mxu0 %vm1156_vm1, %v864_v47 }
 0x1f7   : > { %2271 = vmatpush3.xpose.msk.msra.mxu0 %vm1156_vm1, %v1009_v39  ;;  %2272 = vmatprep.mubr.msk.f32.mxu0 %vm2602_vm0, %v2601_v28  ;;  %v720_v18 = vadd.f32 %v719_v54, %v502_v17  ;;  %v718_v22 = vadd.f32 %v717_v52, %v498_v20 }
 0x1f8   : > { %2275 = vmatprep.subr.mxu0 %v2601_v28 }
 0x1f9   : > { %v1020_v34 = vcombine.low %v718_v22, %v720_v18  ;;  %v1021_v36 = vcombine.high %v718_v22, %v720_v18 }
 0x1fa   : > { %2273 = vmatmul.mubr.msk.f32.vlgmr.msra.gmra.mxu0 %vm1156_vm1, %v865_v49 }
 0x1fb   : > { %2276 = vmatpush3.xpose.msk.msra.mxu0 %vm1156_vm1, %v1010_v41  ;;  %2277 = vmatprep.mubr.msk.f32.mxu0 %vm2602_vm0, %v2601_v28  ;;  %v1028_v41 = vrot.slane %v1020_v34, %v2816_v35  ;;  %v1964_v34 = vld [vmem:[#allocation8 + $0xa0] sm:$0xff] }
 0x1fc   : > { %2280 = vmatprep.subr.mxu0 %v2601_v28 }
 0x1fe   : > { %2278 = vmatmul.mubr.msk.f32.vlgmr.msra.gmra.mxu0 %vm1156_vm1, %v866_v50 }
 0x1ff   : > { %2281 = vmatpush3.xpose.msk.msra.mxu0 %vm1156_vm1, %v1011_v42  ;;  %2282 = vmatprep.mubr.msk.f32.mxu0 %vm2602_vm0, %v2601_v28  ;;  %v1035_v42 = vrot.slane %v1021_v36, %v2816_v35  ;;  %v1963_v36 = vld [vmem:[#allocation8 + $0x98] sm:$0xff] }
 0x202   : > { %2283 = vmatmul.mubr.msk.f32.vlgmr.msra.gmra.mxu0 %vm1156_vm1, %v867_v51 }
 0x2b6   : > { %v1229_v55 = vpop.f32.mrf.mxu0 }
 0x2b7   : > { %v1462_v58 = vsel %vm1461_vm2, %v1229_v55, -inf }
 0x2b8   : > { %1463 = vmax.xlane.f32.xlu0 %v1462_v58  ;;  %v2269_v59 = vpop.f32.mrf.mxu0 }
 0x2ba   : > { %v1305_v60 = vpop.f32.mrf.mxu0 }
 0x2bb   : > { %v1465_v61 = vsel %vm1461_vm2, %v1305_v60, -inf }
 0x2bc   : > { %1466 = vmax.xlane.f32.xlu1 %v1465_v61  ;;  %v2274_v62 = vpop.f32.mrf.mxu0 }
 0x2be   : > { %v1381_v63 = vpop.f32.mrf.mxu0 }
 0x2bf   : > { %v1468_v0 = vsel %vm1461_vm2, %v1381_v63, -inf }
 0x2c0   : > { %1469 = vmax.xlane.f32.xlu0 %v1468_v0  ;;  %v2279_v2 = vpop.f32.mrf.mxu0 }
 0x2c2   : > { %v1457_v3 = vpop.f32.mrf.mxu0 }
 0x2c3   : > { %v1471_v4 = vsel %vm1461_vm2, %v1457_v3, -inf }
 0x2c4   : > { %1472 = vmax.xlane.f32.xlu0 %v1471_v4  ;;  %v2284_v5 = vpop.f32.mrf.mxu0 }
 0x341   : > { %v1464_v6 = vpop.xlane.xlu0 %1463 }
 0x342   : > { %v1474_v7 = vsub.f32 %v1229_v55, %v1464_v6 }
 0x344   : > { %v1478_v8 = vmul.f32 1.442695, %v1474_v7 }
 0x345   : > { %v1467_v9 = vpop.xlane.xlu1 %1466 }
 0x346   : > { %2396 = vpow2.f32 %v1478_v8  ;;  %v1475_v10 = vsub.f32 %v1305_v60, %v1467_v9 }
 0x348   : > { %v1480_v11 = vmul.f32 1.442695, %v1475_v10 }
 0x349   : > { %v1470_v21 = vpop.xlane.xlu0 %1469 }
 0x34a   : > { %2398 = vpow2.f32 %v1480_v11  ;;  %v1476_v23 = vsub.f32 %v1381_v63, %v1470_v21 }
 0x34c   : > { %v1482_v25 = vmul.f32 1.442695, %v1476_v23 }
 0x34d   : > { %v1473_v24 = vpop.xlane.xlu0 %1472 }
 0x34e   : > { %v1477_v26 = vsub.f32 %v1457_v3, %v1473_v24  ;;  %2400 = vpow2.f32 %v1482_v25  ;;  %v1975_v24 = vld [vmem:[#allocation8 + $0xf8] sm:$0xff]  ;;  %v1974_v25 = vld [vmem:[#allocation8 + $0xf0] sm:$0xff] }
 0x350   : > { %v1484_v27 = vmul.f32 1.442695, %v1477_v26  ;;  %v1973_v26 = vld [vmem:[#allocation8 + $0xe8] sm:$0xff] }
 0x352   : > { %2402 = vpow2.f32 %v1484_v27  ;;  %v1972_v27 = vld [vmem:[#allocation8 + $0xe0] sm:$0xff] }
 0x353   : > { %v2874_v12 = vpop.eup %2396 }
 0x354   : > { %v1486_v13 = vsel %vm1461_vm2, %v2874_v12, 0.0 }
 0x355   : > { %1487 = vadd.xlane.f32.xlu1 %v1486_v13 }
 0x357   : > { %v2878_v14 = vpop.eup %2398 }
 0x358   : > { %v1489_v15 = vsel %vm1461_vm2, %v2878_v14, 0.0 }
 0x359   : > { %1490 = vadd.xlane.f32.xlu0 %v1489_v15 }
 0x35b   : > { %v2888_v29 = vpop.eup %2400 }
 0x35c   : > { %v1492_v30 = vsel %vm1461_vm2, %v2888_v29, 0.0 }
 0x35f   : > { %v2892_v31 = vpop.eup %2402 }
 0x360   : > { %v1495_v56 = vsel %vm1461_vm2, %v2892_v31, 0.0 }
 0x366   : > { %1017 = vrot.lane.b32.xlu1 %v720_v18, %s2600_s24 }
 0x36f   : > { %1013 = vrot.lane.b32.xlu0 %v718_v22, %s2600_s24 }
 0x38a   : > { %1493 = vadd.xlane.f32.xlu1 %v1492_v30  ;;  %v1971_v30 = vld [vmem:[#allocation8 + $0xd8] sm:$0xff] }
 0x38e   : > { %1496 = vadd.xlane.f32.xlu1 %v1495_v56  ;;  %v1969_v56 = vld [vmem:[#allocation8 + $0xc8] sm:$0xff] }
 0x3de   : > { %v1488_v32 = vpop.xlane.xlu1 %1487 }
 0x3df   : > { %2404 = vrcp.f32 %v1488_v32  ;;  %v1968_v32 = vld [vmem:[#allocation8 + $0xc0] sm:$0xff] }
 0x3e2   : > { %v1491_v33 = vpop.xlane.xlu0 %1490  ;;  %v1018_v1 = vpop.permute.xlu1 %1017 }
 0x3e3   : > { %2406 = vrcp.f32 %v1491_v33  ;;  %v1967_v33 = vld [vmem:[#allocation8 + $0xb8] sm:$0xff] }
 0x3e6   : > { %v1014_v37 = vpop.permute.xlu0 %1013 }
 0x3e7   : > { %v1036_v38 = vcombine.low %v1014_v37, %v1018_v1  ;;  %v1037_v39 = vcombine.high %v1014_v37, %v1018_v1  ;;  %v1962_v1 = vld [vmem:[#allocation8 + $0x90] sm:$0xff]  ;;  %v1961_v37 = vld [vmem:[#allocation8 + $0x88] sm:$0xff] }
 0x3e9   : > { %v1044_v43 = vrot.slane %v1036_v38, %v2816_v35  ;;  %v1051_v44 = vrot.slane %v1037_v39, %v2816_v35  ;;  %v1960_v38 = vld [vmem:[#allocation8 + $0x80] sm:$0xff]  ;;  %v1959_v39 = vld [vmem:[#allocation8 + $0x78] sm:$0xff] }
 0x3eb   : > { %v1052_v45 = vcombine.low %v1028_v41, %v1044_v43  ;;  %v1053_v46 = vcombine.high %v1028_v41, %v1044_v43  ;;  %v1068_v47 = vcombine.low %v1035_v42, %v1051_v44  ;;  %v1069_v49 = vcombine.high %v1035_v42, %v1051_v44  ;;  %v1958_v41 = vld [vmem:[#allocation8 + $0x70] sm:$0xff]  ;;  %v1957_v42 = vld [vmem:[#allocation8 + $0x68] sm:$0xff]  ;;  %v1956_v43 = vld [vmem:[#allocation8 + $0x60] sm:$0xff] }
 0x3ec   : > { %v2405_v4 = vpop.eup %2404  ;;  %v1955_v44 = vld [vmem:[#allocation8 + $0x58] sm:$0xff] }
 0x3ed   : > { %v1060_v50 = vrot.slane %v1052_v45, %v2819_v40  ;;  %v1067_v51 = vrot.slane %v1053_v46, %v2819_v40  ;;  %v1076_v52 = vrot.slane %v1068_v47, %v2819_v40  ;;  %v1083_v54 = vrot.slane %v1069_v49, %v2819_v40  ;;  %v1954_v45 = vld [vmem:[#allocation8 + $0x50] sm:$0xff]  ;;  %v1953_v46 = vld [vmem:[#allocation8 + $0x48] sm:$0xff]  ;;  %v1952_v47 = vld [vmem:[#allocation8 + $0x40] sm:$0xff] }
 0x3ee   : > { %v1502_v10 = vmul.f32 %v2405_v4, %v2874_v12  ;;  %v1951_v49 = vld [vmem:[#allocation8 + $0x38] sm:$0xff]  ;;  %v2000_v4 = vld [vmem:[#allocation8 + $0x1c0] sm:$0xff] }
 0x3ef   : > { %v1088_v55 = vcombine.low %v1060_v50, %v1067_v51  ;;  %v2226_v58 = vcombine.high %v1060_v50, %v1067_v51  ;;  %v1104_v59 = vcombine.low %v1076_v52, %v1083_v54  ;;  %v2227_v60 = vcombine.high %v1076_v52, %v1083_v54  ;;  %v1950_v50 = vld [vmem:[#allocation8 + $0x30] sm:$0xff]  ;;  %v1949_v51 = vld [vmem:[#allocation8 + $0x28] sm:$0xff]  ;;  %v1948_v52 = vld [vmem:[#allocation8 + $0x20] sm:$0xff] }
 0x3f0   : > { %v2407_v11 = vpop.eup %2406  ;;  %v1947_v54 = vld [vmem:[#allocation8 + $0x18] sm:$0xff] }
 0x3f1   : > { %v1095_v61 = vrot.slane %v1088_v55, %v2816_v35  ;;  %v1103_v62 = vrot.slane %v2226_v58, %v2816_v35  ;;  %v1111_v63 = vrot.slane %v1104_v59, %v2816_v35  ;;  %v1119_v0 = vrot.slane %v2227_v60, %v2816_v35  ;;  %v1946_v55 = vld [vmem:[#allocation8 + $0x10] sm:$0xff]  ;;  %v1945_v58 = vld [vmem:[#allocation8 + $0x8] sm:$0xff]  ;;  %v1944_v59 = vld [vmem:[#allocation8] sm:$0xff] }
 0x3f2   : > { %v1503_v17 = vmul.f32 %v2407_v11, %v2878_v14  ;;  %v2007_v60 = vld [vmem:[#allocation8 + $0x1f8] sm:$0xff]  ;;  %v1993_v11 = vld [vmem:[#allocation8 + $0x188] sm:$0xff] }
 0x3f3   : > { %v1120_v2 = vcombine.low %v1095_v61, %v1103_v62  ;;  %v1136_v3 = vcombine.low %v1111_v63, %v1119_v0  ;;  %v1121_v7 = vcombine.high %v1095_v61, %v1103_v62  ;;  %v1137_v8 = vcombine.high %v1111_v63, %v1119_v0  ;;  %v2006_v61 = vld [vmem:[#allocation8 + $0x1f0] sm:$0xff]  ;;  %v2005_v62 = vld [vmem:[#allocation8 + $0x1e8] sm:$0xff]  ;;  %v2004_v63 = vld [vmem:[#allocation8 + $0x1e0] sm:$0xff] }
 0x3f4   : > { %v2003_v0 = vld [vmem:[#allocation8 + $0x1d8] sm:$0xff] }
 0x3f5   : > { %v1128_v5 = vrot.slane %v1120_v2, %v2819_v40  ;;  %v1144_v6 = vrot.slane %v1136_v3, %v2819_v40  ;;  %v1135_v15 = vrot.slane %v1121_v7, %v2819_v40  ;;  %v1151_v16 = vrot.slane %v1137_v8, %v2819_v40  ;;  %v2002_v2 = vld [vmem:[#allocation8 + $0x1d0] sm:$0xff]  ;;  %v2001_v3 = vld [vmem:[#allocation8 + $0x1c8] sm:$0xff]  ;;  %v1996_v8 = vld [vmem:[#allocation8 + $0x1a0] sm:$0xff] }
 0x3f6   : > { %v1997_v7 = vld [vmem:[#allocation8 + $0x1a8] sm:$0xff] }
 0x3f7   : > { %v1152_v9 = vcombine.low %v1128_v5, %v1144_v6  ;;  %v1153_v13 = vcombine.high %v1128_v5, %v1144_v6  ;;  %v1154_v12 = vcombine.low %v1135_v15, %v1151_v16  ;;  %v1155_v22 = vcombine.high %v1135_v15, %v1151_v16  ;;  %v1999_v5 = vld [vmem:[#allocation8 + $0x1b8] sm:$0xff]  ;;  %v1998_v6 = vld [vmem:[#allocation8 + $0x1b0] sm:$0xff] }
 0x3f8   : > { %v1991_v15 = vld [vmem:[#allocation8 + $0x178] sm:$0xff]  ;;  %v1990_v16 = vld [vmem:[#allocation8 + $0x170] sm:$0xff] }
 0x3f9   : > { %2286 = vmatpush3.msra.mxu1 %v1152_v9  ;;  %v1995_v9 = vld [vmem:[#allocation8 + $0x198] sm:$0xff] }
 0x3fa   : > { %2288 = vmatmul.mubr.msk.f32.vlgmr.msra.gmra.mxu1 %vm1461_vm2, %v1502_v10  ;;  %2290 = vmatprep.subr.mxu1 %v2601_v28  ;;  %v1994_v10 = vld [vmem:[#allocation8 + $0x190] sm:$0xff] }
 0x3fb   : > { %2291 = vmatpush3.msra.mxu1 %v1153_v13  ;;  %2292 = vmatprep.mubr.msk.f32.mxu1 %vm2602_vm0, %v2601_v28  ;;  %v1992_v13 = vld [vmem:[#allocation8 + $0x180] sm:$0xff] }
 0x3fc   : > { %2295 = vmatprep.subr.mxu1 %v2601_v28 }
 0x3fe   : > { %2293 = vmatmul.mubr.msk.f32.vlgmr.msra.gmra.mxu1 %vm1461_vm2, %v1503_v17  ;;  %v1989_v17 = vld [vmem:[#allocation8 + $0x168] sm:$0xff] }
 0x3ff   : > { %2296 = vmatpush3.msra.mxu1 %v1154_v12  ;;  %2297 = vmatprep.mubr.msk.f32.mxu1 %vm2602_vm0, %v2601_v28  ;;  %v1988_v12 = vld [vmem:[#allocation8 + $0x160] sm:$0xff] }
 0x400   : > { %2300 = vmatprep.subr.mxu1 %v2601_v28 }
 0x413   : > { %v1494_v18 = vpop.xlane.xlu1 %1493 }
 0x414   : > { %2408 = vrcp.f32 %v1494_v18  ;;  %v1987_v18 = vld [vmem:[#allocation8 + $0x158] sm:$0xff] }
 0x417   : > { %v1497_v19 = vpop.xlane.xlu1 %1496 }
 0x418   : > { %2410 = vrcp.f32 %v1497_v19  ;;  %v1986_v19 = vld [vmem:[#allocation8 + $0x150] sm:$0xff] }
 0x421   : > { %v2409_v20 = vpop.eup %2408 }
 0x422   : > { %v1504_v21 = vmul.f32 %v2409_v20, %v2888_v29  ;;  %v1970_v29 = vld [vmem:[#allocation8 + $0xd0] sm:$0xff]  ;;  %v1985_v20 = vld [vmem:[#allocation8 + $0x148] sm:$0xff] }
 0x424   : > { %2298 = vmatmul.mubr.msk.f32.vlgmr.msra.gmra.mxu1 %vm1461_vm2, %v1504_v21  ;;  %v1984_v21 = vld [vmem:[#allocation8 + $0x140] sm:$0xff] }
 0x425   : > { %v2411_v14 = vpop.eup %2410  ;;  %2301 = vmatpush3.msra.mxu1 %v1155_v22  ;;  %2302 = vmatprep.mubr.msk.f32.mxu1 %vm2602_vm0, %v2601_v28  ;;  %v1966_v28 = vld [vmem:[#allocation8 + $0xb0] sm:$0xff]  ;;  %v1983_v22 = vld [vmem:[#allocation8 + $0x138] sm:$0xff] }
 0x426   : > { %v1505_v23 = vmul.f32 %v2411_v14, %v2892_v31  ;;  %2020 = vmatprep.subr.mxu1 %v1975_v24  ;;  %v1965_v31 = vld [vmem:[#allocation8 + $0xa8] sm:$0xff]  ;;  %v1982_v14 = vld [vmem:[#allocation8 + $0x130] sm:$0xff]  ;;  %v1980_v24 = vld [vmem:[#allocation8 + $0x120] sm:$0xff] }
 0x428   : > { %2303 = vmatmul.mubr.msk.f32.vlgmr.msra.gmra.mxu1 %vm1461_vm2, %v1505_v23  ;;  %v1981_v23 = vld [vmem:[#allocation8 + $0x128] sm:$0xff] }
 0x429   : > { %2021 = vmatpush1.msra.mxu1 %v1974_v25 }
 0x42a   : > { %2022 = vmatprep.subr.mxu1 %v1973_v26 }
 0x42b   : > { %2023 = vmatpush1.msra.mxu1 %v1972_v27 }
 0x42c   : > { %2024 = vmatprep.subr.mxu1 %v1971_v30 }
 0x42d   : > { %2025 = vmatpush1.msra.mxu1 %v1970_v29 }
 0x42e   : > { %2026 = vmatprep.subr.mxu1 %v1969_v56 }
 0x42f   : > { %2027 = vmatpush1.msra.mxu1 %v1968_v32 }
 0x430   : > { %2028 = vmatprep.subr.mxu1 %v1967_v33 }
 0x431   : > { %2029 = vmatpush1.msra.mxu1 %v1966_v28 }
 0x432   : > { %2030 = vmatprep.subr.mxu1 %v1965_v31 }
 0x433   : > { %2031 = vmatpush1.msra.mxu1 %v1964_v34 }
 0x434   : > { %2032 = vmatprep.subr.mxu1 %v1963_v36 }
 0x435   : > { %2033 = vmatpush1.msra.mxu1 %v1962_v1 }
 0x436   : > { %2034 = vmatprep.subr.mxu1 %v1961_v37 }
 0x437   : > { %2035 = vmatpush1.msra.mxu1 %v1960_v38 }
 0x438   : > { %2036 = vmatprep.subr.mxu1 %v1959_v39 }
 0x439   : > { %2037 = vmatpush1.msra.mxu1 %v1958_v41 }
 0x43a   : > { %2038 = vmatprep.subr.mxu1 %v1957_v42 }
 0x43b   : > { %2039 = vmatpush1.msra.mxu1 %v1956_v43 }
 0x43c   : > { %2040 = vmatprep.subr.mxu1 %v1955_v44 }
 0x43d   : > { %2041 = vmatpush1.msra.mxu1 %v1954_v45 }
 0x43e   : > { %2042 = vmatprep.subr.mxu1 %v1953_v46 }
 0x43f   : > { %2043 = vmatpush1.msra.mxu1 %v1952_v47 }
 0x440   : > { %2044 = vmatprep.subr.mxu1 %v1951_v49 }
 0x441   : > { %2045 = vmatpush1.msra.mxu1 %v1950_v50  ;;  %v1979_v50 = vld [vmem:[#allocation8 + $0x118] sm:$0xff] }
 0x442   : > { %2046 = vmatprep.subr.mxu1 %v1949_v51  ;;  %v1978_v51 = vld [vmem:[#allocation8 + $0x110] sm:$0xff] }
 0x443   : > { %2047 = vmatpush1.msra.mxu1 %v1948_v52  ;;  %v1977_v52 = vld [vmem:[#allocation8 + $0x108] sm:$0xff] }
 0x444   : > { %2048 = vmatprep.subr.mxu1 %v1947_v54 }
 0x445   : > { %2049 = vmatpush1.msra.mxu1 %v1946_v55 }
 0x446   : > { %2050 = vmatprep.subr.mxu1 %v1945_v58 }
 0x447   : > { %2051 = vmatpush1.msra.mxu1 %v1944_v59 }
 0x448   : > { %2052 = vmatprep.subr.mxu1 %v2007_v60  ;;  %v1976_v60 = vld [vmem:[#allocation8 + $0x100] sm:$0xff] }
 0x449   : > { %2053 = vmatpush2.msra.mxu1 %v2006_v61 }
 0x44a   : > { %2054 = vmatprep.subr.mxu1 %v2005_v62 }
 0x44b   : > { %2055 = vmatpush2.msra.mxu1 %v2004_v63 }
 0x44c   : > { %2056 = vmatprep.subr.mxu1 %v2003_v0 }
 0x44d   : > { %2057 = vmatpush2.msra.mxu1 %v2002_v2 }
 0x44e   : > { %2058 = vmatprep.subr.mxu1 %v2001_v3 }
 0x44f   : > { %2059 = vmatpush2.msra.mxu1 %v2000_v4 }
 0x450   : > { %2060 = vmatprep.subr.mxu1 %v1999_v5 }
 0x451   : > { %2061 = vmatpush2.msra.mxu1 %v1998_v6 }
 0x452   : > { %2062 = vmatprep.subr.mxu1 %v1997_v7 }
 0x453   : > { %2063 = vmatpush2.msra.mxu1 %v1996_v8 }
 0x454   : > { %2064 = vmatprep.subr.mxu1 %v1995_v9 }
 0x455   : > { %2065 = vmatpush2.msra.mxu1 %v1994_v10 }
 0x456   : > { %2066 = vmatprep.subr.mxu1 %v1993_v11 }
 0x457   : > { %2067 = vmatpush2.msra.mxu1 %v1992_v13 }
 0x458   : > { %2068 = vmatprep.subr.mxu1 %v1991_v15 }
 0x459   : > { %2069 = vmatpush2.msra.mxu1 %v1990_v16 }
 0x45a   : > { %2070 = vmatprep.subr.mxu1 %v1989_v17 }
 0x45b   : > { %2071 = vmatpush2.msra.mxu1 %v1988_v12 }
 0x45c   : > { %2072 = vmatprep.subr.mxu1 %v1987_v18 }
 0x45d   : > { %2073 = vmatpush2.msra.mxu1 %v1986_v19 }
 0x45e   : > { %2074 = vmatprep.subr.mxu1 %v1985_v20 }
 0x45f   : > { %2075 = vmatpush2.msra.mxu1 %v1984_v21 }
 0x460   : > { %2076 = vmatprep.subr.mxu1 %v1983_v22 }
 0x461   : > { %2077 = vmatpush2.msra.mxu1 %v1982_v14 }
 0x462   : > { %2078 = vmatprep.subr.mxu1 %v1981_v23 }
 0x463   : > { %2079 = vmatpush2.msra.mxu1 %v1980_v24 }
 0x464   : > { %2080 = vmatprep.subr.mxu1 %v1979_v50 }
 0x465   : > { %2081 = vmatpush2.msra.mxu1 %v1978_v51 }
 0x466   : > { %2082 = vmatprep.subr.mxu1 %v1977_v52 }
 0x467   : > { %2083 = vmatpush2.msra.mxu1 %v1976_v60 }
 0x4ba   : > { %v1575_v25 = vpop.f32.mrf.mxu1 }
 0x4bc   : > { %v2289_v26 = vpop.f32.mrf.mxu1 }
 0x4be   : > { %v1648_v27 = vpop.f32.mrf.mxu1 }
 0x4c0   : > { %v2294_v30 = vpop.f32.mrf.mxu1 }
 0x4e4   : > { %v1721_v29 = vpop.f32.mrf.mxu1 }
 0x4e5   : > { %v1798_v32 = vcombine.low %v1575_v25, %v1721_v29  ;;  %v1799_v33 = vcombine.high %v1575_v25, %v1721_v29 }
 0x4e6   : > { %v2299_v56 = vpop.f32.mrf.mxu1 }
 0x4e7   : > { %v1806_v1 = vrot.slane %v1798_v32, %v2816_v35  ;;  %v1813_v37 = vrot.slane %v1799_v33, %v2816_v35 }
 0x4e8   : > { %v1794_v28 = vpop.f32.mrf.mxu1 }
 0x4e9   : > { %v1814_v31 = vcombine.low %v1648_v27, %v1794_v28  ;;  %v1815_v34 = vcombine.high %v1648_v27, %v1794_v28 }
 0x4ea   : > { %v2304_v36 = vpop.f32.mrf.mxu1 }
 0x4eb   : > { %v1822_v38 = vrot.slane %v1814_v31, %v2816_v35  ;;  %v1829_v39 = vrot.slane %v1815_v34, %v2816_v35 }
 0x4ed   : > { %v1830_v41 = vcombine.low %v1806_v1, %v1822_v38  ;;  %v1831_v42 = vcombine.high %v1806_v1, %v1822_v38  ;;  %v1846_v43 = vcombine.low %v1813_v37, %v1829_v39  ;;  %v1847_v44 = vcombine.high %v1813_v37, %v1829_v39 }
 0x4ef   : > { %v1838_v45 = vrot.slane %v1830_v41, %v2819_v40  ;;  %v1845_v46 = vrot.slane %v1831_v42, %v2819_v40  ;;  %v1854_v47 = vrot.slane %v1846_v43, %v2819_v40  ;;  %v1861_v49 = vrot.slane %v1847_v44, %v2819_v40 }
 0x4f1   : > { %v1866_v54 = vcombine.low %v1838_v45, %v1845_v46  ;;  %v2240_v55 = vcombine.high %v1838_v45, %v1845_v46  ;;  %v1882_v58 = vcombine.low %v1854_v47, %v1861_v49  ;;  %v2241_v59 = vcombine.high %v1854_v47, %v1861_v49 }
 0x4f3   : > { %v1873_v61 = vrot.slane %v1866_v54, %v2816_v35  ;;  %v1881_v62 = vrot.slane %v2240_v55, %v2816_v35  ;;  %v1889_v63 = vrot.slane %v1882_v58, %v2816_v35  ;;  %v1897_v0 = vrot.slane %v2241_v59, %v2816_v35 }
 0x4f5   : > { %v1898_v2 = vcombine.low %v1873_v61, %v1881_v62  ;;  %v1899_v3 = vcombine.high %v1873_v61, %v1881_v62  ;;  %v1914_v4 = vcombine.low %v1889_v63, %v1897_v0  ;;  %v1915_v5 = vcombine.high %v1889_v63, %v1897_v0 }
 0x4f7   : > { %v1906_v6 = vrot.slane %v1898_v2, %v2819_v40  ;;  %v1913_v7 = vrot.slane %v1899_v3, %v2819_v40  ;;  %v1922_v8 = vrot.slane %v1914_v4, %v2819_v40  ;;  %v1929_v9 = vrot.slane %v1915_v5, %v2819_v40  ;;  %v2008_v40 = vld [vmem:[%s2996_s4] sm:$0x3] }
 0x4f8   : > { %v2013_v20 = vrot.slane %v2008_v40, %v481_v53  ;;  %v2017_v21 = vrot.slane %v2008_v40, %v485_v57 }
 0x4f9   : > { %v1931_v10 = vcombine.high %v1906_v6, %v1922_v8  ;;  %v1933_v11 = vcombine.high %v1913_v7, %v1929_v9  ;;  %v1932_v13 = vcombine.low %v1913_v7, %v1929_v9  ;;  %v1930_v35 = vcombine.low %v1906_v6, %v1922_v8 }
 0x4fb   : > { %v2391_v15 = vpack.i.bf16 %v1931_v10, %v1933_v11 }
 0x4fd   : > { %2392 = vrot.lane.b32.xlu0 %v2391_v15, %s2600_s24 }
 0x56f   : > { %v2393_v16 = vpop.permute.xlu0 %2392 }
 0x570   : > { %v2395_v17 = vunpack.i.h.bf16 %v2393_v16  ;;  %v2394_v12 = vunpack.i.l.bf16 %v2393_v16 }
 0x572   : > { %v1943_v18 = vsel %vm1156_vm1, %v1932_v13, %v2394_v12  ;;  %v1942_v19 = vsel %vm1156_vm1, %v1930_v35, %v2395_v17 }
 0x573   : > { %2084 = vmatprep.mubr.f32.mxu1 %v1943_v18 }
 0x574   : > { %2085 = vmatmul.mubr.f32.vlgmr.msra.gmra.mxu1 %v1942_v19 }
 0x634   : > { %v2086_v22 = vpop.f32.mrf.mxu1 }
 0x635   : > { %v2087_v14 = vadd.f32 %v2086_v22, %v2013_v20 }
 0x636   : > { %v2088_v23 = vpop.f32.mrf.mxu1 }
 0x637   : > { %2091 = vst [vmem:[%s282_s23] sm:$0xff] %v2087_v14  ;;  %v2089_v24 = vadd.f32 %v2088_v23, %v2017_v21 }
 0x639   : > { %2092 = vst [vmem:[%s282_s23 + $0x8] sm:$0xff] %v2089_v24 }
 0x63a   : > { %2531 = shalt.err (!%p2528_p9)
}
 0x63b   : > { %s2532_s7 = scalar_lea.hbm %s2106_s13, 256  ;;  %s2536_s24 = scalar_lea.hbm %s2997_s5, 512 }
 0x63c   : > { %p2533_p13 = scmp.ne.s32.totalorder %s2106_s13, %s2532_s7  ;;  %p2537_p11 = scmp.lt.s32.totalorder %s2106_s13, %s2997_s5 }
 0x63d   : > { %p2538_p1 = scmp.lt.s32.totalorder %s2536_s24, %s2532_s7 }
 0x63e   : > { %p2534_p8 = pnand %p2533_p13, %p3015_p6 }
 0x63f   : > { %p2539_p2 = por %p2538_p1, %p2537_p11 }
 0x640   : > { %p2535_p10 = pneg %p2534_p8 }
 0x642   : > { %p2540_p4 = pnand %p2539_p2, %p2535_p10 }
 0x644   : > { %2543 = shalt.err (!%p2540_p4)
}
 0x645   : > { %2319 = dma.vmem_to_hbm [thread:$0]  (%p3015_p6), %s2109_s27, 256, %s2106_s13, %s2094_s29  }
 0x646 PF: > { %s2120_s17 = sand.u32 1, %s2578_s18   ;;  %p3016_p12 = scmp.ne.s32.totalorder %s3003_s25, 0 }
 0x647   : > { %p3017_p0 = scmp.ge.s32.totalorder %s2590_s21, 2  ;;  %s2121_s23 = scalar_lea.sflag [#allocation4], %s2120_s17 }
 0x649   : > { %p2336_p5 = pnand %p3017_p0, %p3016_p12 }
 0x64b   : > { %p2337_p3 = pneg %p2336_p5 }
 0x64d   : > { %2573 = dma.done.wait (%p2337_p3), %s2121_s23, 256  }
 0x64e   : > { %2575 = vsyncadd (%p2337_p3), %s2121_s23, 4294967040  ;;  %p20_p7 = scmp.ge.s32.totalorder %s2716_s6, 4   ;;  %s3018_s18 = smov %s2582_s19 }
 0x64f   : > { %s3019_s19 = smov %s2586_s20  ;;  %s3020_s20 = smov %s2726_s10 }
 0x650   : > { %s3021_s21 = smov %s2716_s6  ;;  %22 = sbr.rel (!%p20_p7) target bundleno = 7 (0x7), region = 97 }
 0x655   :  { %2126 = vsyncpa [#allocation3], 1 }
 0x656   :  { %2128 = vsyncpa [#allocation3 + $0x1], 1 }
 0x657   :  { %2129 = vsyncpa [#allocation6], 1 }
 0x658   :  { %2130 = vsyncpa [#allocation9], 1 }
 0x659   :  { %2131 = vsyncpa [#allocation4], 1 }
 0x65a   :  { %2133 = vsyncpa [#allocation4 + $0x1], 1 }

</bundles_post_ra>
